<compile_context>
chip_gen: v7x
topology: tpu7x:2x2x1
jax: 0.10.0
libtpu: 0.0.40
codegen_flags: <defaults>
</compile_context>

<pallas_src>
import functools

import numpy as np
import jax
import jax.numpy as jnp
from jax.experimental import pallas as pl
from jax.experimental.pallas import tpu as pltpu


def _ca_sa_kernel(rgb_ref, d_ref, w1t_rgb_ref, w1t_dep_ref, w2_ref, tap_ref,
                  o_ref, s_ref, *, C, H, W, block_n, ksize):
    """Fused CA_Enhance + SA_Enhance forward for one block of batch elements.

    rgb_ref     : (block_n*C, HW)  rgb features, spatial flattened on lanes
    d_ref       : (block_n*C, HW)  depth features
    w1t_rgb_ref : (C, 2C)          fc1^T rows that multiply the rgb max-pool
    w1t_dep_ref : (C, 2C)          fc1^T rows that multiply the depth max-pool
    w2_ref      : (C, 2C)          fc2 weight (out, in)
    tap_ref     : (K*K, HW)        7x7 tap weights pre-multiplied by the
                                   zero-padding validity mask per output pos
    o_ref       : (block_n*C, HW)  depth_enhance
    s_ref       : (block_n, HW)    VMEM scratch: sublane-packed SA input map
    """
    HW = H * W
    P = ksize // 2

    w1t_rgb = w1t_rgb_ref[...]                         # (C, 2C)
    w1t_dep = w1t_dep_ref[...]                         # (C, 2C)
    w2 = w2_ref[...]                                   # (C, 2C)

    # ---- CA_Enhance + channel max, streamed one batch element at a time ----
    # Only (C, HW) slices are ever live in vregs; the full block stays in VMEM.
    for b in range(block_n):
        rows = pl.ds(b * C, C)
        rgb_b = rgb_ref[rows, :]                       # (C, HW)
        d_b = d_ref[rows, :]                           # (C, HW)
        rmax = jnp.max(rgb_b, axis=1, keepdims=True)   # (C, 1)  AdaptiveMaxPool2d(1)
        dmax = jnp.max(d_b, axis=1, keepdims=True)     # (C, 1)
        # fc1 applied as its rgb / depth column blocks (the channel concat is
        # never materialized).  2C is tiny -> exact f32 VPU broadcast+reduce,
        # the MXU gains nothing at these sizes.
        y1 = (jnp.sum(rmax * w1t_rgb, axis=0, keepdims=True)
              + jnp.sum(dmax * w1t_dep, axis=0, keepdims=True))   # (1, 2C)
        y1 = jnp.maximum(y1, 0.0)                                 # ReLU
        y2 = jnp.sum(w2 * y1, axis=1, keepdims=True)              # (C, 1)
        ca = 1.0 / (1.0 + jnp.exp(-y2))                # exact sigmoid (tiny)
        # SA input: channel max of depth * sigmoid(CA) -> one sublane row.
        s_ref[pl.ds(b, 1), :] = jnp.max(d_b * ca, axis=0, keepdims=True)

    # ---- SA_Enhance on the sublane-packed (block_n, HW) map -----------------
    s2 = s_ref[...]                                    # (block_n, HW)
    # Hoist the tap loads out of the 49-iteration loop when they fit in vregs;
    # otherwise fall back to per-iteration (1, HW) ref loads to avoid spills.
    hoist = (ksize * ksize * HW * 4) <= (64 * 1024)
    taps_v = tap_ref[...] if hoist else None
    acc0 = jnp.zeros_like(s2)                          # two independent partials
    acc1 = jnp.zeros_like(s2)                          # break the serial add chain
    for dy in range(-P, P + 1):
        for dx in range(-P, P + 1):
            k = (dy + P) * ksize + (dx + P)
            off = dy * W + dx                          # static Python int
            # Tap row k already folds the weight and the zero-padding mask,
            # so a circular lane roll is exact (masked lanes contribute 0).
            shifted = s2 if off == 0 else pltpu.roll(s2, (-off) % HW, 1)
            tap_k = taps_v[k:k + 1, :] if hoist else tap_ref[k:k + 1, :]
            term = tap_k * shifted
            if k % 2 == 0:
                acc0 = acc0 + term
            else:
                acc1 = acc1 + term
    acc = acc0 + acc1
    # HW-sized sigmoid: exp + approximate reciprocal both land on the EUP,
    # keeping VALU slots free for the surrounding multiplies.
    sa = pl.reciprocal(1.0 + jnp.exp(-acc), approx=True)   # (block_n, HW)

    # ---- depth_enhance = depth * sa (broadcast over channels) ---------------
    for b in range(block_n):
        rows = pl.ds(b * C, C)
        o_ref[rows, :] = (d_ref[rows, :] * sa[b:b + 1, :]).astype(o_ref.dtype)


def build_tap_weights(wconv, H, W):
    """(K*K, H*W) masked tap weights for the zero-padded KxK conv.

    Row k = (dy+P)*K + (dx+P) holds wconv[dy+P, dx+P] at every output position
    whose tap (dy, dx) stays inside the image, else 0.  Pure weight
    preprocessing, O(K^2 * HW).
    """
    wc = np.asarray(wconv, dtype=np.float32)           # (K, K)
    K = wc.shape[0]
    P = K // 2
    HW = H * W
    ii = np.arange(HW) // W
    jj = np.arange(HW) % W
    taps = np.zeros((K * K, HW), dtype=np.float32)
    for dy in range(-P, P + 1):
        for dx in range(-P, P + 1):
            k = (dy + P) * K + (dx + P)
            valid = (ii + dy >= 0) & (ii + dy < H) & (jj + dx >= 0) & (jj + dx < W)
            taps[k] = wc[dy + P, dx + P] * valid.astype(np.float32)
    return jnp.asarray(taps)


def _tpu_vmem_info():
    """(physical VMEM bytes, prefer >= 2 grid steps) per TPU generation.

    v5e / v6e: 128 MiB VMEM, single TensorCore -> fewer, larger blocks win.
    v7x: 64 MiB VMEM, 2 TensorCores -> keep >= 2 'parallel' steps so both
    cores get work.  Unknown chips: conservative 64 MiB.
    """
    kind = ""
    try:
        kind = jax.devices()[0].device_kind.lower()
    except Exception:
        pass
    if "v7" in kind:
        return 64 * 2**20, True
    if "v5" in kind or "v6" in kind:
        return 128 * 2**20, False
    return 64 * 2**20, False


def _pick_block_n(N, C, HW, vmem_bytes, prefer_two_steps, itemsize=4):
    """Batch elements per grid step, sized against VMEM and the (8,128) rule."""
    per_n = 3 * 2 * C * HW * itemsize     # rgb + depth + out, double-buffered
    budget = vmem_bytes // 2              # headroom: taps, scratch, compiler slack
    cap = max(1, min(N, budget // max(per_n, 1)))
    if prefer_two_steps and N >= 2:
        cap = min(cap, max(1, N // 2))    # keep both v7x TensorCores busy

    def layout_ok(bn):
        # Block second-minor dim (bn*C) must be a multiple of 8 or the full dim,
        # and bn must divide N (no partial blocks feeding the max-reductions).
        return N % bn == 0 and ((bn * C) % 8 == 0 or bn == N)

    for bn in range(cap, 0, -1):
        if layout_ok(bn):
            return bn
    return N   # bn == N always satisfies the BlockSpec layout constraint


@jax.jit
def ca_sa_enhance(rgb, depth, w1, w2, taps):
    """rgb, depth: (N, C, H, W) float32 (NCHW, like the PyTorch module).

    w1: fc1 weight (2C, 2C) (out, in);  w2: fc2 weight (C, 2C) (out, in);
    taps: build_tap_weights(wconv, H, W).
    """
    N, C, H, W = depth.shape
    HW = H * W
    ksize = int(round(float(np.sqrt(taps.shape[0]))))
    vmem_bytes, prefer_two = _tpu_vmem_info()
    block_n = _pick_block_n(N, C, HW, vmem_bytes, prefer_two)
    bc = block_n * C

    # Collapsing (N, C) -> N*C is a free reshape of contiguous NCHW and keeps
    # every DMA tile of the big streams sublane-dense even when C < 8.
    rgb2 = rgb.reshape(N * C, HW)
    d2 = depth.reshape(N * C, HW)
    w1t = w1.T                                          # (2C_in, 2C_out)
    w1t_rgb = w1t[:C]                                   # (C, 2C) rgb columns of fc1
    w1t_dep = w1t[C:]                                   # (C, 2C) depth columns of fc1

    kernel = functools.partial(_ca_sa_kernel, C=C, H=H, W=W,
                               block_n=block_n, ksize=ksize)
    grid_spec = pltpu.PrefetchScalarGridSpec(
        num_scalar_prefetch=0,
        grid=(N // block_n,),
        in_specs=[
            pl.BlockSpec((bc, HW), lambda n: (n, 0)),        # rgb   (collapsed)
            pl.BlockSpec((bc, HW), lambda n: (n, 0)),        # depth (collapsed)
            pl.BlockSpec((C, 2 * C), lambda n: (0, 0)),      # fc1^T (rgb rows)
            pl.BlockSpec((C, 2 * C), lambda n: (0, 0)),      # fc1^T (depth rows)
            pl.BlockSpec((C, 2 * C), lambda n: (0, 0)),      # fc2
            pl.BlockSpec(taps.shape, lambda n: (0, 0)),      # masked tap weights
        ],
        out_specs=pl.BlockSpec((bc, HW), lambda n: (n, 0)),
        scratch_shapes=[pltpu.VMEM((block_n, HW), jnp.float32)],
    )
    # TODO(synk): on v6e, if xprof shows exposed DMA at step boundaries, bump
    # the two stream in_specs to pipeline_mode=pl.Buffered(3) (VMEM headroom).
    out = pl.pallas_call(
        kernel,
        out_shape=jax.ShapeDtypeStruct((N * C, HW), depth.dtype),
        grid_spec=grid_spec,
        compiler_params=pltpu.CompilerParams(
            dimension_semantics=("parallel",),
            vmem_limit_bytes=int(vmem_bytes * 3 // 4)),
    )(rgb2, d2, w1t_rgb, w1t_dep, w2, taps)
    return out.reshape(N, C, H, W)


def reference(rgb, depth, w1, w2, wconv):
    """Pure-JAX reference matching the PyTorch forward semantics."""
    hp = jax.lax.Precision.HIGHEST
    x = jnp.concatenate([rgb, depth], axis=1)            # (N, 2C, H, W)
    xmax = jnp.max(x, axis=(2, 3), keepdims=True)        # AdaptiveMaxPool2d(1)
    y1 = jax.nn.relu(jnp.einsum('oi,nihw->nohw', w1, xmax, precision=hp))
    y2 = jnp.einsum('oi,nihw->nohw', w2, y1, precision=hp)
    ca = jax.nn.sigmoid(y2)                              # (N, C, 1, 1)
    x_d = depth * ca
    s = jnp.max(x_d, axis=1, keepdims=True)              # (N, 1, H, W)
    conv = jax.lax.conv_general_dilated(
        s, wconv.reshape(1, 1, 7, 7), window_strides=(1, 1),
        padding=((3, 3), (3, 3)),
        dimension_numbers=('NCHW', 'OIHW', 'NCHW'),
        precision=hp)
    sa = jax.nn.sigmoid(conv)
    return depth * sa


if __name__ == "__main__":
    key = jax.random.PRNGKey(0)
    k1, k2, k3, k4, k5 = jax.random.split(key, 5)

    N, C, H, W = 2, 4, 16, 16          # in_planes = 2*C = 8 (rgb/depth have C=4 each)
    in_planes = 2 * C

    rgb = jax.random.normal(k1, (N, C, H, W), jnp.float32)
    depth = jax.random.normal(k2, (N, C, H, W), jnp.float32)

    # Deterministic synthetic parameters (shapes from the module __init__):
    w1 = 0.3 * jax.random.normal(k3, (in_planes, in_planes), jnp.float32)        # fc1 (out, in)
    w2 = 0.3 * jax.random.normal(k4, (in_planes // 2, in_planes), jnp.float32)   # fc2 (out, in)
    wconv = 0.15 * jax.random.normal(k5, (7, 7), jnp.float32)                    # SA conv (1,1,7,7)

    taps = build_tap_weights(wconv, H, W)

    out = ca_sa_enhance(rgb, depth, w1, w2, taps)
    out = jax.block_until_ready(out)

    ref = reference(rgb, depth, w1, w2, wconv)
    np.testing.assert_allclose(np.asarray(out), np.asarray(ref), rtol=5e-3, atol=5e-3)
    print("KERNEL_OK")
</pallas_src>

<mosaic_0001>
module attributes {stable_mosaic.version = 11 : i64} {
  func.func @_ca_sa_kernel(%arg0: i32, %arg1: memref<8x256xf32, #tpu.memory_space<vmem>>, %arg2: memref<8x256xf32, #tpu.memory_space<vmem>>, %arg3: memref<4x8xf32, #tpu.memory_space<vmem>>, %arg4: memref<4x8xf32, #tpu.memory_space<vmem>>, %arg5: memref<4x8xf32, #tpu.memory_space<vmem>>, %arg6: memref<49x256xf32, #tpu.memory_space<vmem>>, %arg7: memref<8x256xf32, #tpu.memory_space<vmem>>, %arg8: memref<2x256xf32, #tpu.memory_space<vmem>>) attributes {dimension_semantics = [#tpu.dimension_semantics<parallel>], iteration_bounds = array<i64: 1>, scalar_prefetch = 0 : i64, scratch_operands = 1 : i64, tpu.core_type = #tpu.core_type<tc>, window_params = [{transform_indices = @transform_0, window_bounds = array<i64: 8, 256>}, {transform_indices = @transform_1, window_bounds = array<i64: 8, 256>}, {pipeline_mode = #tpu.pipeline_mode<synchronous>, transform_indices = @transform_2, window_bounds = array<i64: 4, 8>}, {pipeline_mode = #tpu.pipeline_mode<synchronous>, transform_indices = @transform_3, window_bounds = array<i64: 4, 8>}, {pipeline_mode = #tpu.pipeline_mode<synchronous>, transform_indices = @transform_4, window_bounds = array<i64: 4, 8>}, {pipeline_mode = #tpu.pipeline_mode<synchronous>, transform_indices = @transform_5, window_bounds = array<i64: 49, 256>}, {transform_indices = @transform_6, window_bounds = array<i64: 8, 256>}]} {
    %c0 = arith.constant 0 : index
    %c0_0 = arith.constant 0 : index
    %0 = vector.load %arg3[%c0, %c0_0] : memref<4x8xf32, #tpu.memory_space<vmem>>, vector<4x8xf32>
    %c0_1 = arith.constant 0 : index
    %c0_2 = arith.constant 0 : index
    %1 = vector.load %arg4[%c0_1, %c0_2] : memref<4x8xf32, #tpu.memory_space<vmem>>, vector<4x8xf32>
    %c0_3 = arith.constant 0 : index
    %c0_4 = arith.constant 0 : index
    %2 = vector.load %arg5[%c0_3, %c0_4] : memref<4x8xf32, #tpu.memory_space<vmem>>, vector<4x8xf32>
    %c0_5 = arith.constant 0 : index
    %c0_6 = arith.constant 0 : index
    %3 = vector.load %arg1[%c0_5, %c0_6] : memref<8x256xf32, #tpu.memory_space<vmem>>, vector<4x256xf32>
    %c0_7 = arith.constant 0 : index
    %c0_8 = arith.constant 0 : index
    %4 = vector.load %arg2[%c0_7, %c0_8] : memref<8x256xf32, #tpu.memory_space<vmem>>, vector<4x256xf32>
    %cst = arith.constant dense<0xFF800000> : vector<4xf32>
    %5 = vector.multi_reduction <maximumf>, %3, %cst [1] : vector<4x256xf32> to vector<4xf32>
    %6 = vector.shape_cast %5 : vector<4xf32> to vector<4x1xf32>
    %cst_9 = arith.constant dense<0xFF800000> : vector<4xf32>
    %7 = vector.multi_reduction <maximumf>, %4, %cst_9 [1] : vector<4x256xf32> to vector<4xf32>
    %8 = vector.shape_cast %7 : vector<4xf32> to vector<4x1xf32>
    %9 = vector.broadcast %6 : vector<4x1xf32> to vector<4x8xf32>
    %10 = arith.mulf %9, %0 : vector<4x8xf32>
    %cst_10 = arith.constant dense<0.000000e+00> : vector<8xf32>
    %11 = vector.multi_reduction <add>, %10, %cst_10 [0] : vector<4x8xf32> to vector<8xf32>
    %12 = vector.shape_cast %11 : vector<8xf32> to vector<1x8xf32>
    %13 = vector.broadcast %8 : vector<4x1xf32> to vector<4x8xf32>
    %14 = arith.mulf %13, %1 : vector<4x8xf32>
    %cst_11 = arith.constant dense<0.000000e+00> : vector<8xf32>
    %15 = vector.multi_reduction <add>, %14, %cst_11 [0] : vector<4x8xf32> to vector<8xf32>
    %16 = vector.shape_cast %15 : vector<8xf32> to vector<1x8xf32>
    %17 = arith.addf %12, %16 : vector<1x8xf32>
    %cst_12 = arith.constant 0.000000e+00 : f32
    %18 = vector.broadcast %cst_12 : f32 to vector<1x8xf32>
    %19 = arith.maximumf %17, %18 : vector<1x8xf32>
    %20 = vector.broadcast %19 : vector<1x8xf32> to vector<4x8xf32>
    %21 = arith.mulf %2, %20 : vector<4x8xf32>
    %cst_13 = arith.constant dense<0.000000e+00> : vector<4xf32>
    %22 = vector.multi_reduction <add>, %21, %cst_13 [1] : vector<4x8xf32> to vector<4xf32>
    %23 = vector.shape_cast %22 : vector<4xf32> to vector<4x1xf32>
    %cst_14 = arith.constant 0.000000e+00 : f32
    %24 = vector.broadcast %cst_14 : f32 to vector<4x1xf32>
    %25 = arith.subf %24, %23 : vector<4x1xf32>
    %26 = math.exp %25 : vector<4x1xf32>
    %cst_15 = arith.constant 1.000000e+00 : f32
    %27 = vector.broadcast %cst_15 : f32 to vector<4x1xf32>
    %28 = arith.addf %27, %26 : vector<4x1xf32>
    %cst_16 = arith.constant 1.000000e+00 : f32
    %29 = vector.broadcast %cst_16 : f32 to vector<4x1xf32>
    %30 = arith.divf %29, %28 : vector<4x1xf32>
    %31 = vector.broadcast %30 : vector<4x1xf32> to vector<4x256xf32>
    %32 = arith.mulf %4, %31 : vector<4x256xf32>
    %cst_17 = arith.constant dense<0xFF800000> : vector<256xf32>
    %33 = vector.multi_reduction <maximumf>, %32, %cst_17 [0] : vector<4x256xf32> to vector<256xf32>
    %34 = vector.shape_cast %33 : vector<256xf32> to vector<1x256xf32>
    %c0_18 = arith.constant 0 : index
    %c0_19 = arith.constant 0 : index
    %35 = vector.load %arg8[%c0_18, %c0_19] : memref<2x256xf32, #tpu.memory_space<vmem>>, vector<1x256xf32>
    tpu.vector_store %arg8[%c0_18, %c0_19], %34 {strides = array<i32>} : memref<2x256xf32, #tpu.memory_space<vmem>>, vector<1x256xf32>,
    %c4 = arith.constant 4 : index
    %c0_20 = arith.constant 0 : index
    %36 = vector.load %arg1[%c4, %c0_20] : memref<8x256xf32, #tpu.memory_space<vmem>>, vector<4x256xf32>
    %c4_21 = arith.constant 4 : index
    %c0_22 = arith.constant 0 : index
    %37 = vector.load %arg2[%c4_21, %c0_22] : memref<8x256xf32, #tpu.memory_space<vmem>>, vector<4x256xf32>
    %cst_23 = arith.constant dense<0xFF800000> : vector<4xf32>
    %38 = vector.multi_reduction <maximumf>, %36, %cst_23 [1] : vector<4x256xf32> to vector<4xf32>
    %39 = vector.shape_cast %38 : vector<4xf32> to vector<4x1xf32>
    %cst_24 = arith.constant dense<0xFF800000> : vector<4xf32>
    %40 = vector.multi_reduction <maximumf>, %37, %cst_24 [1] : vector<4x256xf32> to vector<4xf32>
    %41 = vector.shape_cast %40 : vector<4xf32> to vector<4x1xf32>
    %42 = vector.broadcast %39 : vector<4x1xf32> to vector<4x8xf32>
    %43 = arith.mulf %42, %0 : vector<4x8xf32>
    %cst_25 = arith.constant dense<0.000000e+00> : vector<8xf32>
    %44 = vector.multi_reduction <add>, %43, %cst_25 [0] : vector<4x8xf32> to vector<8xf32>
    %45 = vector.shape_cast %44 : vector<8xf32> to vector<1x8xf32>
    %46 = vector.broadcast %41 : vector<4x1xf32> to vector<4x8xf32>
    %47 = arith.mulf %46, %1 : vector<4x8xf32>
    %cst_26 = arith.constant dense<0.000000e+00> : vector<8xf32>
    %48 = vector.multi_reduction <add>, %47, %cst_26 [0] : vector<4x8xf32> to vector<8xf32>
    %49 = vector.shape_cast %48 : vector<8xf32> to vector<1x8xf32>
    %50 = arith.addf %45, %49 : vector<1x8xf32>
    %cst_27 = arith.constant 0.000000e+00 : f32
    %51 = vector.broadcast %cst_27 : f32 to vector<1x8xf32>
    %52 = arith.maximumf %50, %51 : vector<1x8xf32>
    %53 = vector.broadcast %52 : vector<1x8xf32> to vector<4x8xf32>
    %54 = arith.mulf %2, %53 : vector<4x8xf32>
    %cst_28 = arith.constant dense<0.000000e+00> : vector<4xf32>
    %55 = vector.multi_reduction <add>, %54, %cst_28 [1] : vector<4x8xf32> to vector<4xf32>
    %56 = vector.shape_cast %55 : vector<4xf32> to vector<4x1xf32>
    %cst_29 = arith.constant 0.000000e+00 : f32
    %57 = vector.broadcast %cst_29 : f32 to vector<4x1xf32>
    %58 = arith.subf %57, %56 : vector<4x1xf32>
    %59 = math.exp %58 : vector<4x1xf32>
    %cst_30 = arith.constant 1.000000e+00 : f32
    %60 = vector.broadcast %cst_30 : f32 to vector<4x1xf32>
    %61 = arith.addf %60, %59 : vector<4x1xf32>
    %cst_31 = arith.constant 1.000000e+00 : f32
    %62 = vector.broadcast %cst_31 : f32 to vector<4x1xf32>
    %63 = arith.divf %62, %61 : vector<4x1xf32>
    %64 = vector.broadcast %63 : vector<4x1xf32> to vector<4x256xf32>
    %65 = arith.mulf %37, %64 : vector<4x256xf32>
    %cst_32 = arith.constant dense<0xFF800000> : vector<256xf32>
    %66 = vector.multi_reduction <maximumf>, %65, %cst_32 [0] : vector<4x256xf32> to vector<256xf32>
    %67 = vector.shape_cast %66 : vector<256xf32> to vector<1x256xf32>
    %c1 = arith.constant 1 : index
    %c0_33 = arith.constant 0 : index
    %68 = vector.load %arg8[%c1, %c0_33] : memref<2x256xf32, #tpu.memory_space<vmem>>, vector<1x256xf32>
    tpu.vector_store %arg8[%c1, %c0_33], %67 {strides = array<i32>} : memref<2x256xf32, #tpu.memory_space<vmem>>, vector<1x256xf32>,
    %c0_34 = arith.constant 0 : index
    %c0_35 = arith.constant 0 : index
    %69 = vector.load %arg8[%c0_34, %c0_35] : memref<2x256xf32, #tpu.memory_space<vmem>>, vector<2x256xf32>
    %c0_36 = arith.constant 0 : index
    %c0_37 = arith.constant 0 : index
    %70 = vector.load %arg6[%c0_36, %c0_37] : memref<49x256xf32, #tpu.memory_space<vmem>>, vector<49x256xf32>
    %cst_38 = arith.constant 0.000000e+00 : f32
    %71 = vector.broadcast %cst_38 : f32 to vector<2x256xf32>
    %cst_39 = arith.constant 0.000000e+00 : f32
    %72 = vector.broadcast %cst_39 : f32 to vector<2x256xf32>
    %c51_i32 = arith.constant 51 : i32
    %73 = tpu.dynamic_rotate %69 by %c51_i32 dim 1 : vector<2x256xf32>, i32 -> vector<2x256xf32>
    %74 = vector.extract_strided_slice %70 {offsets = [0, 0], sizes = [1, 256], strides = [1, 1]} : vector<49x256xf32> to vector<1x256xf32>
    %75 = vector.broadcast %74 : vector<1x256xf32> to vector<2x256xf32>
    %76 = arith.mulf %75, %73 : vector<2x256xf32>
    %77 = arith.addf %71, %76 : vector<2x256xf32>
    %c50_i32 = arith.constant 50 : i32
    %78 = tpu.dynamic_rotate %69 by %c50_i32 dim 1 : vector<2x256xf32>, i32 -> vector<2x256xf32>
    %79 = vector.extract_strided_slice %70 {offsets = [1, 0], sizes = [1, 256], strides = [1, 1]} : vector<49x256xf32> to vector<1x256xf32>
    %80 = vector.broadcast %79 : vector<1x256xf32> to vector<2x256xf32>
    %81 = arith.mulf %80, %78 : vector<2x256xf32>
    %82 = arith.addf %72, %81 : vector<2x256xf32>
    %c49_i32 = arith.constant 49 : i32
    %83 = tpu.dynamic_rotate %69 by %c49_i32 dim 1 : vector<2x256xf32>, i32 -> vector<2x256xf32>
    %84 = vector.extract_strided_slice %70 {offsets = [2, 0], sizes = [1, 256], strides = [1, 1]} : vector<49x256xf32> to vector<1x256xf32>
    %85 = vector.broadcast %84 : vector<1x256xf32> to vector<2x256xf32>
    %86 = arith.mulf %85, %83 : vector<2x256xf32>
    %87 = arith.addf %77, %86 : vector<2x256xf32>
    %c48_i32 = arith.constant 48 : i32
    %88 = tpu.dynamic_rotate %69 by %c48_i32 dim 1 : vector<2x256xf32>, i32 -> vector<2x256xf32>
    %89 = vector.extract_strided_slice %70 {offsets = [3, 0], sizes = [1, 256], strides = [1, 1]} : vector<49x256xf32> to vector<1x256xf32>
    %90 = vector.broadcast %89 : vector<1x256xf32> to vector<2x256xf32>
    %91 = arith.mulf %90, %88 : vector<2x256xf32>
    %92 = arith.addf %82, %91 : vector<2x256xf32>
    %c47_i32 = arith.constant 47 : i32
    %93 = tpu.dynamic_rotate %69 by %c47_i32 dim 1 : vector<2x256xf32>, i32 -> vector<2x256xf32>
    %94 = vector.extract_strided_slice %70 {offsets = [4, 0], sizes = [1, 256], strides = [1, 1]} : vector<49x256xf32> to vector<1x256xf32>
    %95 = vector.broadcast %94 : vector<1x256xf32> to vector<2x256xf32>
    %96 = arith.mulf %95, %93 : vector<2x256xf32>
    %97 = arith.addf %87, %96 : vector<2x256xf32>
    %c46_i32 = arith.constant 46 : i32
    %98 = tpu.dynamic_rotate %69 by %c46_i32 dim 1 : vector<2x256xf32>, i32 -> vector<2x256xf32>
    %99 = vector.extract_strided_slice %70 {offsets = [5, 0], sizes = [1, 256], strides = [1, 1]} : vector<49x256xf32> to vector<1x256xf32>
    %100 = vector.broadcast %99 : vector<1x256xf32> to vector<2x256xf32>
    %101 = arith.mulf %100, %98 : vector<2x256xf32>
    %102 = arith.addf %92, %101 : vector<2x256xf32>
    %c45_i32 = arith.constant 45 : i32
    %103 = tpu.dynamic_rotate %69 by %c45_i32 dim 1 : vector<2x256xf32>, i32 -> vector<2x256xf32>
    %104 = vector.extract_strided_slice %70 {offsets = [6, 0], sizes = [1, 256], strides = [1, 1]} : vector<49x256xf32> to vector<1x256xf32>
    %105 = vector.broadcast %104 : vector<1x256xf32> to vector<2x256xf32>
    %106 = arith.mulf %105, %103 : vector<2x256xf32>
    %107 = arith.addf %97, %106 : vector<2x256xf32>
    %c35_i32 = arith.constant 35 : i32
    %108 = tpu.dynamic_rotate %69 by %c35_i32 dim 1 : vector<2x256xf32>, i32 -> vector<2x256xf32>
    %109 = vector.extract_strided_slice %70 {offsets = [7, 0], sizes = [1, 256], strides = [1, 1]} : vector<49x256xf32> to vector<1x256xf32>
    %110 = vector.broadcast %109 : vector<1x256xf32> to vector<2x256xf32>
    %111 = arith.mulf %110, %108 : vector<2x256xf32>
    %112 = arith.addf %102, %111 : vector<2x256xf32>
    %c34_i32 = arith.constant 34 : i32
    %113 = tpu.dynamic_rotate %69 by %c34_i32 dim 1 : vector<2x256xf32>, i32 -> vector<2x256xf32>
    %114 = vector.extract_strided_slice %70 {offsets = [8, 0], sizes = [1, 256], strides = [1, 1]} : vector<49x256xf32> to vector<1x256xf32>
    %115 = vector.broadcast %114 : vector<1x256xf32> to vector<2x256xf32>
    %116 = arith.mulf %115, %113 : vector<2x256xf32>
    %117 = arith.addf %107, %116 : vector<2x256xf32>
    %c33_i32 = arith.constant 33 : i32
    %118 = tpu.dynamic_rotate %69 by %c33_i32 dim 1 : vector<2x256xf32>, i32 -> vector<2x256xf32>
    %119 = vector.extract_strided_slice %70 {offsets = [9, 0], sizes = [1, 256], strides = [1, 1]} : vector<49x256xf32> to vector<1x256xf32>
    %120 = vector.broadcast %119 : vector<1x256xf32> to vector<2x256xf32>
    %121 = arith.mulf %120, %118 : vector<2x256xf32>
    %122 = arith.addf %112, %121 : vector<2x256xf32>
    %c32_i32 = arith.constant 32 : i32
    %123 = tpu.dynamic_rotate %69 by %c32_i32 dim 1 : vector<2x256xf32>, i32 -> vector<2x256xf32>
    %124 = vector.extract_strided_slice %70 {offsets = [10, 0], sizes = [1, 256], strides = [1, 1]} : vector<49x256xf32> to vector<1x256xf32>
    %125 = vector.broadcast %124 : vector<1x256xf32> to vector<2x256xf32>
    %126 = arith.mulf %125, %123 : vector<2x256xf32>
    %127 = arith.addf %117, %126 : vector<2x256xf32>
    %c31_i32 = arith.constant 31 : i32
    %128 = tpu.dynamic_rotate %69 by %c31_i32 dim 1 : vector<2x256xf32>, i32 -> vector<2x256xf32>
    %129 = vector.extract_strided_slice %70 {offsets = [11, 0], sizes = [1, 256], strides = [1, 1]} : vector<49x256xf32> to vector<1x256xf32>
    %130 = vector.broadcast %129 : vector<1x256xf32> to vector<2x256xf32>
    %131 = arith.mulf %130, %128 : vector<2x256xf32>
    %132 = arith.addf %122, %131 : vector<2x256xf32>
    %c30_i32 = arith.constant 30 : i32
    %133 = tpu.dynamic_rotate %69 by %c30_i32 dim 1 : vector<2x256xf32>, i32 -> vector<2x256xf32>
    %134 = vector.extract_strided_slice %70 {offsets = [12, 0], sizes = [1, 256], strides = [1, 1]} : vector<49x256xf32> to vector<1x256xf32>
    %135 = vector.broadcast %134 : vector<1x256xf32> to vector<2x256xf32>
    %136 = arith.mulf %135, %133 : vector<2x256xf32>
    %137 = arith.addf %127, %136 : vector<2x256xf32>
    %c29_i32 = arith.constant 29 : i32
    %138 = tpu.dynamic_rotate %69 by %c29_i32 dim 1 : vector<2x256xf32>, i32 -> vector<2x256xf32>
    %139 = vector.extract_strided_slice %70 {offsets = [13, 0], sizes = [1, 256], strides = [1, 1]} : vector<49x256xf32> to vector<1x256xf32>
    %140 = vector.broadcast %139 : vector<1x256xf32> to vector<2x256xf32>
    %141 = arith.mulf %140, %138 : vector<2x256xf32>
    %142 = arith.addf %132, %141 : vector<2x256xf32>
    %c19_i32 = arith.constant 19 : i32
    %143 = tpu.dynamic_rotate %69 by %c19_i32 dim 1 : vector<2x256xf32>, i32 -> vector<2x256xf32>
    %144 = vector.extract_strided_slice %70 {offsets = [14, 0], sizes = [1, 256], strides = [1, 1]} : vector<49x256xf32> to vector<1x256xf32>
    %145 = vector.broadcast %144 : vector<1x256xf32> to vector<2x256xf32>
    %146 = arith.mulf %145, %143 : vector<2x256xf32>
    %147 = arith.addf %137, %146 : vector<2x256xf32>
    %c18_i32 = arith.constant 18 : i32
    %148 = tpu.dynamic_rotate %69 by %c18_i32 dim 1 : vector<2x256xf32>, i32 -> vector<2x256xf32>
    %149 = vector.extract_strided_slice %70 {offsets = [15, 0], sizes = [1, 256], strides = [1, 1]} : vector<49x256xf32> to vector<1x256xf32>
    %150 = vector.broadcast %149 : vector<1x256xf32> to vector<2x256xf32>
    %151 = arith.mulf %150, %148 : vector<2x256xf32>
    %152 = arith.addf %142, %151 : vector<2x256xf32>
    %c17_i32 = arith.constant 17 : i32
    %153 = tpu.dynamic_rotate %69 by %c17_i32 dim 1 : vector<2x256xf32>, i32 -> vector<2x256xf32>
    %154 = vector.extract_strided_slice %70 {offsets = [16, 0], sizes = [1, 256], strides = [1, 1]} : vector<49x256xf32> to vector<1x256xf32>
    %155 = vector.broadcast %154 : vector<1x256xf32> to vector<2x256xf32>
    %156 = arith.mulf %155, %153 : vector<2x256xf32>
    %157 = arith.addf %147, %156 : vector<2x256xf32>
    %c16_i32 = arith.constant 16 : i32
    %158 = tpu.dynamic_rotate %69 by %c16_i32 dim 1 : vector<2x256xf32>, i32 -> vector<2x256xf32>
    %159 = vector.extract_strided_slice %70 {offsets = [17, 0], sizes = [1, 256], strides = [1, 1]} : vector<49x256xf32> to vector<1x256xf32>
    %160 = vector.broadcast %159 : vector<1x256xf32> to vector<2x256xf32>
    %161 = arith.mulf %160, %158 : vector<2x256xf32>
    %162 = arith.addf %152, %161 : vector<2x256xf32>
    %c15_i32 = arith.constant 15 : i32
    %163 = tpu.dynamic_rotate %69 by %c15_i32 dim 1 : vector<2x256xf32>, i32 -> vector<2x256xf32>
    %164 = vector.extract_strided_slice %70 {offsets = [18, 0], sizes = [1, 256], strides = [1, 1]} : vector<49x256xf32> to vector<1x256xf32>
    %165 = vector.broadcast %164 : vector<1x256xf32> to vector<2x256xf32>
    %166 = arith.mulf %165, %163 : vector<2x256xf32>
    %167 = arith.addf %157, %166 : vector<2x256xf32>
    %c14_i32 = arith.constant 14 : i32
    %168 = tpu.dynamic_rotate %69 by %c14_i32 dim 1 : vector<2x256xf32>, i32 -> vector<2x256xf32>
    %169 = vector.extract_strided_slice %70 {offsets = [19, 0], sizes = [1, 256], strides = [1, 1]} : vector<49x256xf32> to vector<1x256xf32>
    %170 = vector.broadcast %169 : vector<1x256xf32> to vector<2x256xf32>
    %171 = arith.mulf %170, %168 : vector<2x256xf32>
    %172 = arith.addf %162, %171 : vector<2x256xf32>
    %c13_i32 = arith.constant 13 : i32
    %173 = tpu.dynamic_rotate %69 by %c13_i32 dim 1 : vector<2x256xf32>, i32 -> vector<2x256xf32>
    %174 = vector.extract_strided_slice %70 {offsets = [20, 0], sizes = [1, 256], strides = [1, 1]} : vector<49x256xf32> to vector<1x256xf32>
    %175 = vector.broadcast %174 : vector<1x256xf32> to vector<2x256xf32>
    %176 = arith.mulf %175, %173 : vector<2x256xf32>
    %177 = arith.addf %167, %176 : vector<2x256xf32>
    %c3_i32 = arith.constant 3 : i32
    %178 = tpu.dynamic_rotate %69 by %c3_i32 dim 1 : vector<2x256xf32>, i32 -> vector<2x256xf32>
    %179 = vector.extract_strided_slice %70 {offsets = [21, 0], sizes = [1, 256], strides = [1, 1]} : vector<49x256xf32> to vector<1x256xf32>
    %180 = vector.broadcast %179 : vector<1x256xf32> to vector<2x256xf32>
    %181 = arith.mulf %180, %178 : vector<2x256xf32>
    %182 = arith.addf %172, %181 : vector<2x256xf32>
    %c2_i32 = arith.constant 2 : i32
    %183 = tpu.dynamic_rotate %69 by %c2_i32 dim 1 : vector<2x256xf32>, i32 -> vector<2x256xf32>
    %184 = vector.extract_strided_slice %70 {offsets = [22, 0], sizes = [1, 256], strides = [1, 1]} : vector<49x256xf32> to vector<1x256xf32>
    %185 = vector.broadcast %184 : vector<1x256xf32> to vector<2x256xf32>
    %186 = arith.mulf %185, %183 : vector<2x256xf32>
    %187 = arith.addf %177, %186 : vector<2x256xf32>
    %c1_i32 = arith.constant 1 : i32
    %188 = tpu.dynamic_rotate %69 by %c1_i32 dim 1 : vector<2x256xf32>, i32 -> vector<2x256xf32>
    %189 = vector.extract_strided_slice %70 {offsets = [23, 0], sizes = [1, 256], strides = [1, 1]} : vector<49x256xf32> to vector<1x256xf32>
    %190 = vector.broadcast %189 : vector<1x256xf32> to vector<2x256xf32>
    %191 = arith.mulf %190, %188 : vector<2x256xf32>
    %192 = arith.addf %182, %191 : vector<2x256xf32>
    %193 = vector.extract_strided_slice %70 {offsets = [24, 0], sizes = [1, 256], strides = [1, 1]} : vector<49x256xf32> to vector<1x256xf32>
    %194 = vector.broadcast %193 : vector<1x256xf32> to vector<2x256xf32>
    %195 = arith.mulf %194, %69 : vector<2x256xf32>
    %196 = arith.addf %187, %195 : vector<2x256xf32>
    %c255_i32 = arith.constant 255 : i32
    %197 = tpu.dynamic_rotate %69 by %c255_i32 dim 1 : vector<2x256xf32>, i32 -> vector<2x256xf32>
    %198 = vector.extract_strided_slice %70 {offsets = [25, 0], sizes = [1, 256], strides = [1, 1]} : vector<49x256xf32> to vector<1x256xf32>
    %199 = vector.broadcast %198 : vector<1x256xf32> to vector<2x256xf32>
    %200 = arith.mulf %199, %197 : vector<2x256xf32>
    %201 = arith.addf %192, %200 : vector<2x256xf32>
    %c254_i32 = arith.constant 254 : i32
    %202 = tpu.dynamic_rotate %69 by %c254_i32 dim 1 : vector<2x256xf32>, i32 -> vector<2x256xf32>
    %203 = vector.extract_strided_slice %70 {offsets = [26, 0], sizes = [1, 256], strides = [1, 1]} : vector<49x256xf32> to vector<1x256xf32>
    %204 = vector.broadcast %203 : vector<1x256xf32> to vector<2x256xf32>
    %205 = arith.mulf %204, %202 : vector<2x256xf32>
    %206 = arith.addf %196, %205 : vector<2x256xf32>
    %c253_i32 = arith.constant 253 : i32
    %207 = tpu.dynamic_rotate %69 by %c253_i32 dim 1 : vector<2x256xf32>, i32 -> vector<2x256xf32>
    %208 = vector.extract_strided_slice %70 {offsets = [27, 0], sizes = [1, 256], strides = [1, 1]} : vector<49x256xf32> to vector<1x256xf32>
    %209 = vector.broadcast %208 : vector<1x256xf32> to vector<2x256xf32>
    %210 = arith.mulf %209, %207 : vector<2x256xf32>
    %211 = arith.addf %201, %210 : vector<2x256xf32>
    %c243_i32 = arith.constant 243 : i32
    %212 = tpu.dynamic_rotate %69 by %c243_i32 dim 1 : vector<2x256xf32>, i32 -> vector<2x256xf32>
    %213 = vector.extract_strided_slice %70 {offsets = [28, 0], sizes = [1, 256], strides = [1, 1]} : vector<49x256xf32> to vector<1x256xf32>
    %214 = vector.broadcast %213 : vector<1x256xf32> to vector<2x256xf32>
    %215 = arith.mulf %214, %212 : vector<2x256xf32>
    %216 = arith.addf %206, %215 : vector<2x256xf32>
    %c242_i32 = arith.constant 242 : i32
    %217 = tpu.dynamic_rotate %69 by %c242_i32 dim 1 : vector<2x256xf32>, i32 -> vector<2x256xf32>
    %218 = vector.extract_strided_slice %70 {offsets = [29, 0], sizes = [1, 256], strides = [1, 1]} : vector<49x256xf32> to vector<1x256xf32>
    %219 = vector.broadcast %218 : vector<1x256xf32> to vector<2x256xf32>
    %220 = arith.mulf %219, %217 : vector<2x256xf32>
    %221 = arith.addf %211, %220 : vector<2x256xf32>
    %c241_i32 = arith.constant 241 : i32
    %222 = tpu.dynamic_rotate %69 by %c241_i32 dim 1 : vector<2x256xf32>, i32 -> vector<2x256xf32>
    %223 = vector.extract_strided_slice %70 {offsets = [30, 0], sizes = [1, 256], strides = [1, 1]} : vector<49x256xf32> to vector<1x256xf32>
    %224 = vector.broadcast %223 : vector<1x256xf32> to vector<2x256xf32>
    %225 = arith.mulf %224, %222 : vector<2x256xf32>
    %226 = arith.addf %216, %225 : vector<2x256xf32>
    %c240_i32 = arith.constant 240 : i32
    %227 = tpu.dynamic_rotate %69 by %c240_i32 dim 1 : vector<2x256xf32>, i32 -> vector<2x256xf32>
    %228 = vector.extract_strided_slice %70 {offsets = [31, 0], sizes = [1, 256], strides = [1, 1]} : vector<49x256xf32> to vector<1x256xf32>
    %229 = vector.broadcast %228 : vector<1x256xf32> to vector<2x256xf32>
    %230 = arith.mulf %229, %227 : vector<2x256xf32>
    %231 = arith.addf %221, %230 : vector<2x256xf32>
    %c239_i32 = arith.constant 239 : i32
    %232 = tpu.dynamic_rotate %69 by %c239_i32 dim 1 : vector<2x256xf32>, i32 -> vector<2x256xf32>
    %233 = vector.extract_strided_slice %70 {offsets = [32, 0], sizes = [1, 256], strides = [1, 1]} : vector<49x256xf32> to vector<1x256xf32>
    %234 = vector.broadcast %233 : vector<1x256xf32> to vector<2x256xf32>
    %235 = arith.mulf %234, %232 : vector<2x256xf32>
    %236 = arith.addf %226, %235 : vector<2x256xf32>
    %c238_i32 = arith.constant 238 : i32
    %237 = tpu.dynamic_rotate %69 by %c238_i32 dim 1 : vector<2x256xf32>, i32 -> vector<2x256xf32>
    %238 = vector.extract_strided_slice %70 {offsets = [33, 0], sizes = [1, 256], strides = [1, 1]} : vector<49x256xf32> to vector<1x256xf32>
    %239 = vector.broadcast %238 : vector<1x256xf32> to vector<2x256xf32>
    %240 = arith.mulf %239, %237 : vector<2x256xf32>
    %241 = arith.addf %231, %240 : vector<2x256xf32>
    %c237_i32 = arith.constant 237 : i32
    %242 = tpu.dynamic_rotate %69 by %c237_i32 dim 1 : vector<2x256xf32>, i32 -> vector<2x256xf32>
    %243 = vector.extract_strided_slice %70 {offsets = [34, 0], sizes = [1, 256], strides = [1, 1]} : vector<49x256xf32> to vector<1x256xf32>
    %244 = vector.broadcast %243 : vector<1x256xf32> to vector<2x256xf32>
    %245 = arith.mulf %244, %242 : vector<2x256xf32>
    %246 = arith.addf %236, %245 : vector<2x256xf32>
    %c227_i32 = arith.constant 227 : i32
    %247 = tpu.dynamic_rotate %69 by %c227_i32 dim 1 : vector<2x256xf32>, i32 -> vector<2x256xf32>
    %248 = vector.extract_strided_slice %70 {offsets = [35, 0], sizes = [1, 256], strides = [1, 1]} : vector<49x256xf32> to vector<1x256xf32>
    %249 = vector.broadcast %248 : vector<1x256xf32> to vector<2x256xf32>
    %250 = arith.mulf %249, %247 : vector<2x256xf32>
    %251 = arith.addf %241, %250 : vector<2x256xf32>
    %c226_i32 = arith.constant 226 : i32
    %252 = tpu.dynamic_rotate %69 by %c226_i32 dim 1 : vector<2x256xf32>, i32 -> vector<2x256xf32>
    %253 = vector.extract_strided_slice %70 {offsets = [36, 0], sizes = [1, 256], strides = [1, 1]} : vector<49x256xf32> to vector<1x256xf32>
    %254 = vector.broadcast %253 : vector<1x256xf32> to vector<2x256xf32>
    %255 = arith.mulf %254, %252 : vector<2x256xf32>
    %256 = arith.addf %246, %255 : vector<2x256xf32>
    %c225_i32 = arith.constant 225 : i32
    %257 = tpu.dynamic_rotate %69 by %c225_i32 dim 1 : vector<2x256xf32>, i32 -> vector<2x256xf32>
    %258 = vector.extract_strided_slice %70 {offsets = [37, 0], sizes = [1, 256], strides = [1, 1]} : vector<49x256xf32> to vector<1x256xf32>
    %259 = vector.broadcast %258 : vector<1x256xf32> to vector<2x256xf32>
    %260 = arith.mulf %259, %257 : vector<2x256xf32>
    %261 = arith.addf %251, %260 : vector<2x256xf32>
    %c224_i32 = arith.constant 224 : i32
    %262 = tpu.dynamic_rotate %69 by %c224_i32 dim 1 : vector<2x256xf32>, i32 -> vector<2x256xf32>
    %263 = vector.extract_strided_slice %70 {offsets = [38, 0], sizes = [1, 256], strides = [1, 1]} : vector<49x256xf32> to vector<1x256xf32>
    %264 = vector.broadcast %263 : vector<1x256xf32> to vector<2x256xf32>
    %265 = arith.mulf %264, %262 : vector<2x256xf32>
    %266 = arith.addf %256, %265 : vector<2x256xf32>
    %c223_i32 = arith.constant 223 : i32
    %267 = tpu.dynamic_rotate %69 by %c223_i32 dim 1 : vector<2x256xf32>, i32 -> vector<2x256xf32>
    %268 = vector.extract_strided_slice %70 {offsets = [39, 0], sizes = [1, 256], strides = [1, 1]} : vector<49x256xf32> to vector<1x256xf32>
    %269 = vector.broadcast %268 : vector<1x256xf32> to vector<2x256xf32>
    %270 = arith.mulf %269, %267 : vector<2x256xf32>
    %271 = arith.addf %261, %270 : vector<2x256xf32>
    %c222_i32 = arith.constant 222 : i32
    %272 = tpu.dynamic_rotate %69 by %c222_i32 dim 1 : vector<2x256xf32>, i32 -> vector<2x256xf32>
    %273 = vector.extract_strided_slice %70 {offsets = [40, 0], sizes = [1, 256], strides = [1, 1]} : vector<49x256xf32> to vector<1x256xf32>
    %274 = vector.broadcast %273 : vector<1x256xf32> to vector<2x256xf32>
    %275 = arith.mulf %274, %272 : vector<2x256xf32>
    %276 = arith.addf %266, %275 : vector<2x256xf32>
    %c221_i32 = arith.constant 221 : i32
    %277 = tpu.dynamic_rotate %69 by %c221_i32 dim 1 : vector<2x256xf32>, i32 -> vector<2x256xf32>
    %278 = vector.extract_strided_slice %70 {offsets = [41, 0], sizes = [1, 256], strides = [1, 1]} : vector<49x256xf32> to vector<1x256xf32>
    %279 = vector.broadcast %278 : vector<1x256xf32> to vector<2x256xf32>
    %280 = arith.mulf %279, %277 : vector<2x256xf32>
    %281 = arith.addf %271, %280 : vector<2x256xf32>
    %c211_i32 = arith.constant 211 : i32
    %282 = tpu.dynamic_rotate %69 by %c211_i32 dim 1 : vector<2x256xf32>, i32 -> vector<2x256xf32>
    %283 = vector.extract_strided_slice %70 {offsets = [42, 0], sizes = [1, 256], strides = [1, 1]} : vector<49x256xf32> to vector<1x256xf32>
    %284 = vector.broadcast %283 : vector<1x256xf32> to vector<2x256xf32>
    %285 = arith.mulf %284, %282 : vector<2x256xf32>
    %286 = arith.addf %276, %285 : vector<2x256xf32>
    %c210_i32 = arith.constant 210 : i32
    %287 = tpu.dynamic_rotate %69 by %c210_i32 dim 1 : vector<2x256xf32>, i32 -> vector<2x256xf32>
    %288 = vector.extract_strided_slice %70 {offsets = [43, 0], sizes = [1, 256], strides = [1, 1]} : vector<49x256xf32> to vector<1x256xf32>
    %289 = vector.broadcast %288 : vector<1x256xf32> to vector<2x256xf32>
    %290 = arith.mulf %289, %287 : vector<2x256xf32>
    %291 = arith.addf %281, %290 : vector<2x256xf32>
    %c209_i32 = arith.constant 209 : i32
    %292 = tpu.dynamic_rotate %69 by %c209_i32 dim 1 : vector<2x256xf32>, i32 -> vector<2x256xf32>
    %293 = vector.extract_strided_slice %70 {offsets = [44, 0], sizes = [1, 256], strides = [1, 1]} : vector<49x256xf32> to vector<1x256xf32>
    %294 = vector.broadcast %293 : vector<1x256xf32> to vector<2x256xf32>
    %295 = arith.mulf %294, %292 : vector<2x256xf32>
    %296 = arith.addf %286, %295 : vector<2x256xf32>
    %c208_i32 = arith.constant 208 : i32
    %297 = tpu.dynamic_rotate %69 by %c208_i32 dim 1 : vector<2x256xf32>, i32 -> vector<2x256xf32>
    %298 = vector.extract_strided_slice %70 {offsets = [45, 0], sizes = [1, 256], strides = [1, 1]} : vector<49x256xf32> to vector<1x256xf32>
    %299 = vector.broadcast %298 : vector<1x256xf32> to vector<2x256xf32>
    %300 = arith.mulf %299, %297 : vector<2x256xf32>
    %301 = arith.addf %291, %300 : vector<2x256xf32>
    %c207_i32 = arith.constant 207 : i32
    %302 = tpu.dynamic_rotate %69 by %c207_i32 dim 1 : vector<2x256xf32>, i32 -> vector<2x256xf32>
    %303 = vector.extract_strided_slice %70 {offsets = [46, 0], sizes = [1, 256], strides = [1, 1]} : vector<49x256xf32> to vector<1x256xf32>
    %304 = vector.broadcast %303 : vector<1x256xf32> to vector<2x256xf32>
    %305 = arith.mulf %304, %302 : vector<2x256xf32>
    %306 = arith.addf %296, %305 : vector<2x256xf32>
    %c206_i32 = arith.constant 206 : i32
    %307 = tpu.dynamic_rotate %69 by %c206_i32 dim 1 : vector<2x256xf32>, i32 -> vector<2x256xf32>
    %308 = vector.extract_strided_slice %70 {offsets = [47, 0], sizes = [1, 256], strides = [1, 1]} : vector<49x256xf32> to vector<1x256xf32>
    %309 = vector.broadcast %308 : vector<1x256xf32> to vector<2x256xf32>
    %310 = arith.mulf %309, %307 : vector<2x256xf32>
    %311 = arith.addf %301, %310 : vector<2x256xf32>
    %c205_i32 = arith.constant 205 : i32
    %312 = tpu.dynamic_rotate %69 by %c205_i32 dim 1 : vector<2x256xf32>, i32 -> vector<2x256xf32>
    %313 = vector.extract_strided_slice %70 {offsets = [48, 0], sizes = [1, 256], strides = [1, 1]} : vector<49x256xf32> to vector<1x256xf32>
    %314 = vector.broadcast %313 : vector<1x256xf32> to vector<2x256xf32>
    %315 = arith.mulf %314, %312 : vector<2x256xf32>
    %316 = arith.addf %306, %315 : vector<2x256xf32>
    %317 = arith.addf %316, %311 : vector<2x256xf32>
    %cst_40 = arith.constant 0.000000e+00 : f32
    %318 = vector.broadcast %cst_40 : f32 to vector<2x256xf32>
    %319 = arith.subf %318, %317 : vector<2x256xf32>
    %320 = math.exp %319 : vector<2x256xf32>
    %cst_41 = arith.constant 1.000000e+00 : f32
    %321 = vector.broadcast %cst_41 : f32 to vector<2x256xf32>
    %322 = arith.addf %321, %320 : vector<2x256xf32>
    %323 = tpu.reciprocal %322 {approx = true} : vector<2x256xf32> -> vector<2x256xf32>
    %c0_42 = arith.constant 0 : index
    %c0_43 = arith.constant 0 : index
    %324 = vector.load %arg2[%c0_42, %c0_43] : memref<8x256xf32, #tpu.memory_space<vmem>>, vector<4x256xf32>
    %325 = vector.extract_strided_slice %323 {offsets = [0, 0], sizes = [1, 256], strides = [1, 1]} : vector<2x256xf32> to vector<1x256xf32>
    %326 = vector.broadcast %325 : vector<1x256xf32> to vector<4x256xf32>
    %327 = arith.mulf %324, %326 : vector<4x256xf32>
    %c0_44 = arith.constant 0 : index
    %c0_45 = arith.constant 0 : index
    %328 = vector.load %arg7[%c0_44, %c0_45] : memref<8x256xf32, #tpu.memory_space<vmem>>, vector<4x256xf32>
    tpu.vector_store %arg7[%c0_44, %c0_45], %327 {strides = array<i32>} : memref<8x256xf32, #tpu.memory_space<vmem>>, vector<4x256xf32>,
    %c4_46 = arith.constant 4 : index
    %c0_47 = arith.constant 0 : index
    %329 = vector.load %arg2[%c4_46, %c0_47] : memref<8x256xf32, #tpu.memory_space<vmem>>, vector<4x256xf32>
    %330 = vector.extract_strided_slice %323 {offsets = [1, 0], sizes = [1, 256], strides = [1, 1]} : vector<2x256xf32> to vector<1x256xf32>
    %331 = vector.broadcast %330 : vector<1x256xf32> to vector<4x256xf32>
    %332 = arith.mulf %329, %331 : vector<4x256xf32>
    %c4_48 = arith.constant 4 : index
    %c0_49 = arith.constant 0 : index
    %333 = vector.load %arg7[%c4_48, %c0_49] : memref<8x256xf32, #tpu.memory_space<vmem>>, vector<4x256xf32>
    tpu.vector_store %arg7[%c4_48, %c0_49], %332 {strides = array<i32>} : memref<8x256xf32, #tpu.memory_space<vmem>>, vector<4x256xf32>,
    return
  }
  func.func @transform_0(%arg0: i32) -> (i32, i32) {
    %c0_i32 = arith.constant 0 : i32
    %c0_i32_0 = arith.constant 0 : i32
    return %arg0, %c0_i32 : i32, i32
  }
  func.func @transform_1(%arg0: i32) -> (i32, i32) {
    %c0_i32 = arith.constant 0 : i32
    %c0_i32_0 = arith.constant 0 : i32
    return %arg0, %c0_i32 : i32, i32
  }
  func.func @transform_2(%arg0: i32) -> (i32, i32) {
    %c0_i32 = arith.constant 0 : i32
    %c0_i32_0 = arith.constant 0 : i32
    %c0_i32_1 = arith.constant 0 : i32
    return %c0_i32, %c0_i32_0 : i32, i32
  }
  func.func @transform_3(%arg0: i32) -> (i32, i32) {
    %c0_i32 = arith.constant 0 : i32
    %c0_i32_0 = arith.constant 0 : i32
    %c0_i32_1 = arith.constant 0 : i32
    return %c0_i32, %c0_i32_0 : i32, i32
  }
  func.func @transform_4(%arg0: i32) -> (i32, i32) {
    %c0_i32 = arith.constant 0 : i32
    %c0_i32_0 = arith.constant 0 : i32
    %c0_i32_1 = arith.constant 0 : i32
    return %c0_i32, %c0_i32_0 : i32, i32
  }
  func.func @transform_5(%arg0: i32) -> (i32, i32) {
    %c0_i32 = arith.constant 0 : i32
    %c0_i32_0 = arith.constant 0 : i32
    %c0_i32_1 = arith.constant 0 : i32
    return %c0_i32, %c0_i32_0 : i32, i32
  }
  func.func @transform_6(%arg0: i32) -> (i32, i32) {
    %c0_i32 = arith.constant 0 : i32
    %c0_i32_0 = arith.constant 0 : i32
    return %arg0, %c0_i32 : i32, i32
  }
}

</mosaic_0001>

<bundles_post_ra>
// kernel: ca_sa_enhance.1
= control target key start
LH: loop header
LB: loop body
LE: loop exit
PB: predicated region body
PF: predicated region fallthrough
CT: control target
= control target key end

     0   :  { %vm113_vm0 = vcmask 1047556   ;;  %vm30_vm1 = vcmask 1043456   ;;  %vm42_vm2 = vcmask 60416   ;;  %s1269_s16 = smov 51   ;;  %s1270_s17 = smov 49   ;;  %s2244_s0 = inlined_call_operand.vmem [shape: f32[8,256], index: 0, kind: input, shape index: {}]   ;;  %s2245_s1 = inlined_call_operand.vmem [shape: f32[8,256], index: 1, kind: input, shape index: {}]   ;;  %s2246_s2 = inlined_call_operand.vmem [shape: f32[4,8], index: 2, kind: input, shape index: {}]   ;;  %s2247_s3 = inlined_call_operand.vmem [shape: f32[4,8], index: 3, kind: input, shape index: {}]   ;;  %s2248_s4 = inlined_call_operand.vmem [shape: f32[4,8], index: 4, kind: input, shape index: {}]   ;;  %s2249_s5 = inlined_call_operand.vmem [shape: f32[49,256], index: 5, kind: input, shape index: {}]   ;;  %s2250_s6 = inlined_call_operand.vmem [shape: f32[8,256], index: 6, kind: output, shape index: {}]  }
   0x1   :  { %v109_v0 = vld [vmem:[%s2244_s0] sm:$0xf0]  ;;  %v110_v1 = vld [vmem:[%s2244_s0 + $0x8] sm:$0xf0]  ;;  %v26_v2 = vld [vmem:[%s2244_s0] sm:$0xf] }
   0x2   :  { %v114_v3 = vsel %vm113_vm0, %v109_v0, -inf  ;;  %v115_v4 = vsel %vm113_vm0, %v110_v1, -inf  ;;  %v27_v5 = vld [vmem:[%s2244_s0 + $0x8] sm:$0xf]  ;;  %v31_v6 = vsel %vm30_vm1, %v26_v2, -inf  ;;  %s1271_s18 = smov 48  }
   0x3   :  { %v116_v7 = vmax.f32 %v114_v3, %v115_v4  ;;  %v32_v8 = vsel %vm30_vm1, %v27_v5, -inf  ;;  %v1370_v9 = vld [vmem:[%s2245_s1] sm:$0xf0]  ;;  %v1375_v10 = vld [vmem:[%s2245_s1 + $0x8] sm:$0xf0]  ;;  %s1272_s19 = smov 47  }
   0x4   :  { %v33_v11 = vmax.f32 %v31_v6, %v32_v8  ;;  %v119_v12 = vsel %vm113_vm0, %v1370_v9, -inf  ;;  %v120_v13 = vsel %vm113_vm0, %v1375_v10, -inf  ;;  %v1384_v14 = vld [vmem:[%s2245_s1] sm:$0xf]  ;;  %v1389_v15 = vld [vmem:[%s2245_s1 + $0x8] sm:$0xf] }
   0x5   :  { %117 = vmax.xlane.f32.xlu0 %v116_v7  ;;  %v121_v16 = vmax.f32 %v119_v12, %v120_v13  ;;  %v36_v17 = vsel %vm30_vm1, %v1384_v14, -inf  ;;  %v37_v18 = vsel %vm30_vm1, %v1389_v15, -inf  ;;  %v23_v20 = vld [vmem:[%s2246_s2] sm:$0xf]  ;;  %s1273_s20 = smov 46   ;;  %s1274_s21 = smov 45  }
   0x6   :  { %34 = vmax.xlane.f32.xlu1 %v33_v11  ;;  %v38_v19 = vmax.f32 %v36_v17, %v37_v18  ;;  %v125_v21 = vrot.slane %v23_v20, 4  ;;  %v24_v22 = vld [vmem:[%s2247_s3] sm:$0xf]  ;;  %s1275_s22 = smov 35   ;;  %s1276_s23 = smov 34  }
   0x7   :  { %v139_v26 = vrot.slane %v24_v22, 4  ;;  %v25_v63 = vld [vmem:[%s2248_s4] sm:$0xf]  ;;  %s1268_s4 = smov 50   ;;  %s1277_s24 = smov 33  }
   0x8   :  { %s1278_s25 = smov 32   ;;  %s1279_s26 = smov 31  }
   0x9   :  { %122 = vmax.xlane.f32.xlu0 %v121_v16  ;;  %s1280_s27 = smov 30   ;;  %s1281_s28 = smov 29  }
   0xa   :  { %39 = vmax.xlane.f32.xlu1 %v38_v19  ;;  %s1282_s29 = smov 19   ;;  %s1283_s30 = smov 18  }
   0xb   :  { %s1284_s7 = smov 17   ;;  %s1285_s8 = smov 16  }
   0xc   :  { %s1286_s0 = smov 15   ;;  %s1287_s9 = smov 14  }
   0xd   :  { %s1288_s10 = smov 13   ;;  %s1289_s11 = smov 3  }
   0xe   :  { %s1290_s12 = smov 2   ;;  %s1291_s13 = smov 1  }
   0xf   :  { %s1292_s14 = smov 127   ;;  %s1293_s15 = smov 126  }
  0x10   :  { %s1294_s2 = smov 125   ;;  %s1295_s3 = smov 115  }
  0x92   :  { %v118_v23 = vpop.xlane.xlu0 %117 }
  0x93   :  { %v127_v24 = vmul.f32 %v125_v21, %v118_v23  ;;  %v35_v25 = vpop.xlane.xlu1 %34 }
  0x94   :  { %v41_v27 = vmul.f32 %v35_v25, %v23_v20 }
  0x95   :  { %v129_v28 = vrot.slane %v127_v24, 4 }
  0x96   :  { %v43_v29 = vsel %vm42_vm2, %v41_v27, 0.0  ;;  %v123_v30 = vpop.xlane.xlu0 %122 }
  0x97   :  { %v131_v31 = vsel %vm42_vm2, %v129_v28, 0.0  ;;  %v44_v32 = vrot.slane %v43_v29, 4  ;;  %v141_v33 = vmul.f32 %v139_v26, %v123_v30  ;;  %v40_v34 = vpop.xlane.xlu1 %39 }
  0x98   :  { %v132_v35 = vrot.slane %v131_v31, 4  ;;  %v50_v36 = vmul.f32 %v40_v34, %v24_v22  ;;  %v92_v34 = vlaneseq }
  0x99   :  { %v45_v37 = vadd.f32 %v44_v32, %v43_v29  ;;  %v143_v38 = vrot.slane %v141_v33, 4  ;;  %v1267_v32 = vmov 1966171168  }
  0x9a   :  { %v133_v39 = vadd.f32 %v132_v35, %v131_v31  ;;  %v51_v40 = vsel %vm42_vm2, %v50_v36, 0.0  ;;  %v90_v33 = vunpack.c.l.s4 %v1267_v32  ;;  %vm106_vm3 = vcmp.lt.s32.totalorder %v92_v34, 256 }
  0x9b   :  { %v46_v41 = vrot.slane %v45_v37, 2  ;;  %v145_v42 = vsel %vm42_vm2, %v143_v38, 0.0  ;;  %v52_v43 = vrot.slane %v51_v40, 4 }
  0x9c   :  { %v134_v44 = vrot.slane %v133_v39, 2  ;;  %v146_v45 = vrot.slane %v145_v42, 4 }
  0x9d   :  { %v47_v46 = vadd.f32 %v46_v41, %v45_v37  ;;  %v53_v47 = vadd.f32 %v52_v43, %v51_v40  ;;  %v91_v43 = vunpack.c.0.s8 %v90_v33 }
  0x9e   :  { %v135_v48 = vadd.f32 %v134_v44, %v133_v39  ;;  %v147_v49 = vadd.f32 %v146_v45, %v145_v42 }
  0x9f   :  { %v54_v50 = vrot.slane %v53_v47, 2  ;;  %v48_v52 = vrot.slane %v47_v46, 1 }
  0xa0   :  { %v148_v51 = vrot.slane %v147_v49, 2  ;;  %v136_v55 = vrot.slane %v135_v48, 1 }
  0xa1   :  { %v55_v53 = vadd.f32 %v54_v50, %v53_v47  ;;  %v49_v58 = vadd.f32 %v48_v52, %v47_v46 }
  0xa2   :  { %v149_v54 = vadd.f32 %v148_v51, %v147_v49  ;;  %v137_v60 = vadd.f32 %v136_v55, %v135_v48 }
  0xa3   :  { %v56_v56 = vrot.slane %v55_v53, 1 }
  0xa4   :  { %v150_v57 = vrot.slane %v149_v54, 1 }
  0xa5   :  { %v57_v59 = vadd.f32 %v56_v56, %v55_v53 }
  0xa6   :  { %v151_v61 = vadd.f32 %v150_v57, %v149_v54 }
  0xa7   :  { %v58_v62 = vadd.f32 %v57_v59, %v49_v58 }
  0xa8   :  { %v152_v0 = vadd.f32 %v151_v61, %v137_v60 }
  0xa9   :  { %v59_v1 = vmax.f32 %v58_v62, 0.0 }
  0xaa   :  { %v153_v2 = vmax.f32 %v152_v0, 0.0 }
  0xab   :  { %v60_v3 = vmul.f32 %v59_v1, %v25_v63 }
  0xac   :  { %v154_v4 = vmul.f32 %v153_v2, %v25_v63  ;;  %v1488_v2 = vand.u32 127, %v92_v34 }
  0xad   :  { %v61_v5 = vsel %vm42_vm2, %v60_v3, 0.0 }
  0xae   :  { %62 = vadd.xlane.f32.xlu1 %v61_v5  ;;  %v155_v6 = vsel %vm42_vm2, %v154_v4, 0.0  ;;  %vm235_vm4 = vcmp.lt.s32.totalorder %v1488_v2, 51  ;;  %vm254_vm5 = vcmp.lt.s32.totalorder %v1488_v2, 50  ;;  %vm273_vm6 = vcmp.lt.s32.totalorder %v1488_v2, 49 }
  0xaf   :  { %156 = vadd.xlane.f32.xlu0 %v155_v6  ;;  %vm292_vm7 = vcmp.lt.s32.totalorder %v1488_v2, 48  ;;  %vm311_vm8 = vcmp.lt.s32.totalorder %v1488_v2, 47  ;;  %vm330_vm9 = vcmp.lt.s32.totalorder %v1488_v2, 46  ;;  %vm349_vm10 = vcmp.lt.s32.totalorder %v1488_v2, 45 }
  0xb0   :  { %vm368_vm11 = vcmp.lt.s32.totalorder %v1488_v2, 35  ;;  %vm387_vm12 = vcmp.lt.s32.totalorder %v1488_v2, 34  ;;  %vm406_vm13 = vcmp.lt.s32.totalorder %v1488_v2, 33  ;;  %vm425_vm14 = vcmp.lt.s32.totalorder %v1488_v2, 32 }
  0xb1   :  { %vm444_vm15 = vcmp.lt.s32.totalorder %v1488_v2, 31  ;;  %vm501_vm2 = vcmp.lt.s32.totalorder %v1488_v2, 19 }
 0x13b   :  { %v63_v7 = vpop.xlane.xlu1 %62 }
 0x13c   :  { %v64_v8 = vsub.f32 0.0, %v63_v7  ;;  %v157_v11 = vpop.xlane.xlu0 %156 }
 0x13d   :  { %v158_v12 = vsub.f32 0.0, %v157_v11  ;;  %v1496_v11 = vld [vmem:[%s2249_s5] sm:$0xff] }
 0x13e   :  { %v65_v13 = vmul.f32 1.442695, %v64_v8 }
 0x13f   :  { %v159_v16 = vmul.f32 1.442695, %v158_v12 }
 0x140   :  { %1251 = vpow2.f32 %v65_v13  ;;  %v1508_v13 = vld [vmem:[%s2249_s5 + $0x8] sm:$0xff] }
 0x141   :  { %1253 = vpow2.f32 %v159_v16 }
 0x14a   :  { %v1252_v17 = vpop.eup %1251 }
 0x14b   :  { %v1254_v18 = vpop.eup %1253  ;;  %v67_v19 = vadd.f32 1.0, %v1252_v17 }
 0x14c   :  { %v161_v20 = vadd.f32 1.0, %v1254_v18 }
 0x14d   :  { %1255 = vrcp.f32 %v67_v19 }
 0x14e   :  { %1257 = vrcp.f32 %v161_v20 }
 0x157   :  { %v1256_v21 = vpop.eup %1255 }
 0x158   :  { %v1258_v22 = vpop.eup %1257  ;;  %v70_v23 = vmul.f32 %v1256_v21, %v1384_v14  ;;  %v71_v24 = vmul.f32 %v1256_v21, %v1389_v15 }
 0x159   :  { %v165_v25 = vrot.slane %v1258_v22, 4 }
 0x15a   :  { %v72_v26 = vsel %vm30_vm1, %v70_v23, -inf  ;;  %v79_v27 = vsel %vm30_vm1, %v71_v24, -inf  ;;  %vm482_vm1 = vcmp.lt.s32.totalorder %v1488_v2, 29 }
 0x15b   :  { %v73_v28 = vrot.slane %v72_v26, 4  ;;  %v80_v29 = vrot.slane %v79_v27, 4  ;;  %v167_v30 = vmul.f32 %v165_v25, %v1370_v9  ;;  %v168_v31 = vmul.f32 %v165_v25, %v1375_v10 }
 0x15c   :  { %v1419_v9 = vshrl.u32 %v92_v34, 7 }
 0x15d   :  { %v74_v35 = vmax.f32 %v72_v26, %v73_v28  ;;  %v81_v36 = vmax.f32 %v79_v27, %v80_v29  ;;  %v169_v14 = vsel %vm113_vm0, %v167_v30, -inf  ;;  %v176_v15 = vsel %vm113_vm0, %v168_v31, -inf }
 0x15e   :  { %v170_v37 = vrot.slane %v169_v14, 4  ;;  %v177_v38 = vrot.slane %v176_v15, 4  ;;  %v94_v51 = vsub.s32 %v91_v43, %v1419_v9  ;;  %v1503_v12 = vsub.s32 2, %v1419_v9 }
 0x15f   :  { %v75_v39 = vrot.slane %v74_v35, 2  ;;  %v82_v40 = vrot.slane %v81_v36, 2  ;;  %v1511_v16 = vsub.s32 0, %v1419_v9  ;;  %v1514_v18 = vsub.s32 1, %v1419_v9 }
 0x160   :  { %v171_v41 = vmax.f32 %v169_v14, %v170_v37  ;;  %v178_v42 = vmax.f32 %v176_v15, %v177_v38  ;;  %v1517_v20 = vsub.s32 3, %v1419_v9  ;;  %v279_v25 = vrot.slane %v1496_v11, %v1503_v12 }
 0x161   :  { %v76_v10 = vmax.f32 %v74_v35, %v75_v39  ;;  %v83_v44 = vmax.f32 %v81_v36, %v82_v40  ;;  %v241_v21 = vrot.slane %v1496_v11, %v1511_v16  ;;  %v245_v24 = vrot.slane %v1508_v13, %v1511_v16 }
 0x162   :  { %v172_v45 = vrot.slane %v171_v41, 2  ;;  %v179_v46 = vrot.slane %v178_v42, 2  ;;  %v283_v26 = vrot.slane %v1508_v13, %v1503_v12  ;;  %v260_v27 = vrot.slane %v1496_v11, %v1514_v18 }
 0x163   :  { %v77_v47 = vrot.slane %v76_v10, 1  ;;  %v84_v48 = vrot.slane %v83_v44, 1  ;;  %v264_v28 = vrot.slane %v1508_v13, %v1514_v18  ;;  %v298_v31 = vrot.slane %v1496_v11, %v1517_v20 }
 0x164   :  { %v173_v49 = vmax.f32 %v171_v41, %v172_v45  ;;  %v180_v50 = vmax.f32 %v178_v42, %v179_v46  ;;  %v1538_v32 = vsub.s32 4, %v1419_v9  ;;  %v302_v36 = vrot.slane %v1508_v13, %v1517_v20 }
 0x165   :  { %v78_v52 = vmax.f32 %v76_v10, %v77_v47  ;;  %v85_v53 = vmax.f32 %v83_v44, %v84_v48  ;;  %v1552_v46 = vsub.s32 5, %v1419_v9  ;;  %vm463_vm0 = vcmp.lt.s32.totalorder %v1488_v2, 30 }
 0x166   :  { %v174_v54 = vrot.slane %v173_v49, 1  ;;  %v181_v55 = vrot.slane %v180_v50, 1  ;;  %v317_v42 = vrot.slane %v1496_v11, %v1538_v32  ;;  %v321_v43 = vrot.slane %v1508_v13, %v1538_v32 }
 0x167   :  { %v88_v56 = vcombine.low %v78_v52, %v85_v53 }
 0x168   :  { %v175_v57 = vmax.f32 %v173_v49, %v174_v54  ;;  %v182_v58 = vmax.f32 %v180_v50, %v181_v55 }
 0x169   :  { %v95_v59 = vrot.slane %v88_v56, %v94_v51  ;;  %v336_v56 = vrot.slane %v1496_v11, %v1552_v46 }
 0x16a   :  { %v185_v60 = vcombine.low %v175_v57, %v182_v58  ;;  %v1562_v57 = vsub.s32 6, %v1419_v9 }
 0x16b   :  { %v102_v61 = vrot.slane %v95_v59, %v94_v51 }
 0x16c   :  { %v192_v62 = vrot.slane %v185_v60, %v94_v51  ;;  %v340_v60 = vrot.slane %v1508_v13, %v1552_v46 }
 0x16d   :  { %108 = vst.msk [vmem:[#allocation2] ss:$2 sm:$0x3] %vm106_vm3, %v102_v61 }
 0x16e   :  { %v199_v63 = vrot.slane %v192_v62, %v94_v51 }
 0x170   :  { %202 = vst.msk [vmem:[#allocation2 + $0x1] ss:$2 sm:$0x3] %vm106_vm3, %v199_v63  ;;  %vm520_vm3 = vcmp.lt.s32.totalorder %v1488_v2, 18 }
 0x177   :  { %v1423_v0 = vld.sshfl [vmem:[#allocation2] sm:$0x33 pattern:$0x76325410] }
 0x178   :  { %250 = vrot.lane.b32.xlu1 %v1423_v0, %s1268_s4  ;;  %229 = vrot.lane.b32.xlu0 %v1423_v0, %s1269_s16  ;;  %v1429_v1 = vcombine.high %v1423_v0, %v1423_v0 }
 0x17c   :  { %269 = vrot.lane.b32.xlu0 %v1423_v0, %s1270_s17  ;;  %231 = vrot.lane.b32.xlu1 %v1429_v1, %s1269_s16  ;;  %s1297_s16 = smov 113  }
 0x180   :  { %288 = vrot.lane.b32.xlu0 %v1423_v0, %s1271_s18  ;;  %252 = vrot.lane.b32.xlu1 %v1429_v1, %s1268_s4  ;;  %s1296_s4 = smov 114  }
 0x184   :  { %307 = vrot.lane.b32.xlu0 %v1423_v0, %s1272_s19  ;;  %271 = vrot.lane.b32.xlu1 %v1429_v1, %s1270_s17  ;;  %s1298_s17 = smov 112  }
 0x188   :  { %326 = vrot.lane.b32.xlu0 %v1423_v0, %s1273_s20  ;;  %290 = vrot.lane.b32.xlu1 %v1429_v1, %s1271_s18  ;;  %s1315_s18 = smov 77  }
 0x18c   :  { %345 = vrot.lane.b32.xlu0 %v1423_v0, %s1274_s21  ;;  %309 = vrot.lane.b32.xlu1 %v1429_v1, %s1272_s19 }
 0x190   :  { %364 = vrot.lane.b32.xlu0 %v1423_v0, %s1275_s22  ;;  %328 = vrot.lane.b32.xlu1 %v1429_v1, %s1273_s20  ;;  %s1299_s20 = smov 111  }
 0x194   :  { %383 = vrot.lane.b32.xlu0 %v1423_v0, %s1276_s23  ;;  %347 = vrot.lane.b32.xlu1 %v1429_v1, %s1274_s21 }
 0x198   :  { %402 = vrot.lane.b32.xlu0 %v1423_v0, %s1277_s24  ;;  %366 = vrot.lane.b32.xlu1 %v1429_v1, %s1275_s22 }
 0x19c   :  { %421 = vrot.lane.b32.xlu0 %v1423_v0, %s1278_s25  ;;  %385 = vrot.lane.b32.xlu1 %v1429_v1, %s1276_s23  ;;  %s1300_s23 = smov 110  }
 0x1a0   :  { %440 = vrot.lane.b32.xlu0 %v1423_v0, %s1279_s26  ;;  %404 = vrot.lane.b32.xlu1 %v1429_v1, %s1277_s24  ;;  %s1301_s24 = smov 109  }
 0x1a4   :  { %459 = vrot.lane.b32.xlu0 %v1423_v0, %s1280_s27  ;;  %423 = vrot.lane.b32.xlu1 %v1429_v1, %s1278_s25  ;;  %s1302_s25 = smov 99  }
 0x1a8   :  { %478 = vrot.lane.b32.xlu0 %v1423_v0, %s1281_s28  ;;  %442 = vrot.lane.b32.xlu1 %v1429_v1, %s1279_s26  ;;  %s1303_s26 = smov 98  }
 0x1ac   :  { %497 = vrot.lane.b32.xlu0 %v1423_v0, %s1282_s29  ;;  %461 = vrot.lane.b32.xlu1 %v1429_v1, %s1280_s27  ;;  %s1304_s27 = smov 97  }
 0x1b0   :  { %516 = vrot.lane.b32.xlu0 %v1423_v0, %s1283_s30  ;;  %480 = vrot.lane.b32.xlu1 %v1429_v1, %s1281_s28  ;;  %s1305_s28 = smov 96  }
 0x1b4   :  { %535 = vrot.lane.b32.xlu0 %v1423_v0, %s1284_s7  ;;  %499 = vrot.lane.b32.xlu1 %v1429_v1, %s1282_s29 }
 0x1b8   :  { %554 = vrot.lane.b32.xlu0 %v1423_v0, %s1285_s8  ;;  %518 = vrot.lane.b32.xlu1 %v1429_v1, %s1283_s30 }
 0x1bc   :  { %573 = vrot.lane.b32.xlu0 %v1423_v0, %s1286_s0  ;;  %537 = vrot.lane.b32.xlu1 %v1429_v1, %s1284_s7 }
 0x1c0   :  { %592 = vrot.lane.b32.xlu0 %v1423_v0, %s1287_s9  ;;  %556 = vrot.lane.b32.xlu1 %v1429_v1, %s1285_s8 }
 0x1c4   :  { %611 = vrot.lane.b32.xlu0 %v1423_v0, %s1288_s10  ;;  %575 = vrot.lane.b32.xlu1 %v1429_v1, %s1286_s0  ;;  %s1306_s0 = smov 95  }
 0x1c8   :  { %630 = vrot.lane.b32.xlu0 %v1423_v0, %s1289_s11  ;;  %594 = vrot.lane.b32.xlu1 %v1429_v1, %s1287_s9  ;;  %s1307_s9 = smov 94  }
 0x1cc   :  { %649 = vrot.lane.b32.xlu0 %v1423_v0, %s1290_s12  ;;  %613 = vrot.lane.b32.xlu1 %v1429_v1, %s1288_s10  ;;  %s1308_s10 = smov 93  }
 0x1d0   :  { %668 = vrot.lane.b32.xlu0 %v1423_v0, %s1291_s13  ;;  %632 = vrot.lane.b32.xlu1 %v1429_v1, %s1289_s11  ;;  %s1309_s11 = smov 83  }
 0x1d4   :  { %699 = vrot.lane.b32.xlu0 %v1423_v0, %s1292_s14  ;;  %651 = vrot.lane.b32.xlu1 %v1429_v1, %s1290_s12  ;;  %s1310_s12 = smov 82  }
 0x1d8   :  { %718 = vrot.lane.b32.xlu0 %v1423_v0, %s1293_s15  ;;  %670 = vrot.lane.b32.xlu1 %v1429_v1, %s1291_s13  ;;  %s1311_s13 = smov 81  }
 0x1dc   :  { %737 = vrot.lane.b32.xlu0 %v1423_v0, %s1294_s2  ;;  %701 = vrot.lane.b32.xlu1 %v1429_v1, %s1292_s14  ;;  %s1312_s14 = smov 80  }
 0x1e0   :  { %756 = vrot.lane.b32.xlu0 %v1423_v0, %s1295_s3  ;;  %720 = vrot.lane.b32.xlu1 %v1429_v1, %s1293_s15  ;;  %s1313_s15 = smov 79  }
 0x1e4   :  { %775 = vrot.lane.b32.xlu0 %v1423_v0, %s1296_s4  ;;  %739 = vrot.lane.b32.xlu1 %v1429_v1, %s1294_s2 }
 0x1e8   :  { %794 = vrot.lane.b32.xlu0 %v1423_v0, %s1297_s16  ;;  %758 = vrot.lane.b32.xlu1 %v1429_v1, %s1295_s3 }
 0x1ea   :  { %v251_v3 = vpop.permute.xlu1 %250  ;;  %v230_v4 = vpop.permute.xlu0 %229 }
 0x1ec   :  { %813 = vrot.lane.b32.xlu0 %v1423_v0, %s1298_s17  ;;  %777 = vrot.lane.b32.xlu1 %v1429_v1, %s1296_s4 }
 0x1ee   :  { %v270_v5 = vpop.permute.xlu0 %269  ;;  %v232_v6 = vpop.permute.xlu1 %231 }
 0x1ef   :  { %v236_v7 = vsel %vm235_vm4, %v230_v4, %v232_v6  ;;  %v237_v8 = vsel %vm235_vm4, %v232_v6, %v230_v4  ;;  %v355_v6 = vrot.slane %v1496_v11, %v1562_v57  ;;  %vm539_vm4 = vcmp.lt.s32.totalorder %v1488_v2, 17 }
 0x1f0   :  { %832 = vrot.lane.b32.xlu0 %v1423_v0, %s1299_s20  ;;  %796 = vrot.lane.b32.xlu1 %v1429_v1, %s1297_s16  ;;  %v246_v33 = vmul.f32 %v241_v21, %v237_v8  ;;  %v247_v14 = vmul.f32 %v245_v24, %v236_v7  ;;  %v1574_v7 = vsub.s32 7, %v1419_v9 }
 0x1f2   :  { %v289_v17 = vpop.permute.xlu0 %288  ;;  %v253_v19 = vpop.permute.xlu1 %252 }
 0x1f3   :  { %v255_v22 = vsel %vm254_vm5, %v251_v3, %v253_v19  ;;  %v256_v23 = vsel %vm254_vm5, %v253_v19, %v251_v3  ;;  %v359_v19 = vrot.slane %v1508_v13, %v1562_v57  ;;  %vm558_vm5 = vcmp.lt.s32.totalorder %v1488_v2, 16 }
 0x1f4   :  { %851 = vrot.lane.b32.xlu0 %v1423_v0, %s1300_s23  ;;  %815 = vrot.lane.b32.xlu1 %v1429_v1, %s1298_s17  ;;  %v265_v10 = vmul.f32 %v260_v27, %v256_v23  ;;  %v266_v47 = vmul.f32 %v264_v28, %v255_v22  ;;  %s1314_s17 = smov 78  }
 0x1f6   :  { %v308_v29 = vpop.permute.xlu0 %307  ;;  %v272_v30 = vpop.permute.xlu1 %271 }
 0x1f7   :  { %v274_v34 = vsel %vm273_vm6, %v270_v5, %v272_v30  ;;  %v275_v35 = vsel %vm273_vm6, %v272_v30, %v270_v5  ;;  %v1595_v30 = vld [vmem:[%s2249_s5 + $0x10] sm:$0xff]  ;;  %vm577_vm6 = vcmp.lt.s32.totalorder %v1488_v2, 15 }
 0x1f8   :  { %v284_v15 = vmul.f32 %v279_v25, %v275_v35  ;;  %v285_v37 = vmul.f32 %v283_v26, %v274_v34  ;;  %870 = vrot.lane.b32.xlu0 %v1423_v0, %s1301_s24  ;;  %834 = vrot.lane.b32.xlu1 %v1429_v1, %s1299_s20  ;;  %v374_v26 = vrot.slane %v1496_v11, %v1574_v7  ;;  %v1600_v11 = vld [vmem:[%s2249_s5 + $0x18] sm:$0xff] }
 0x1fa   :  { %v286_v38 = vadd.f32 %v284_v15, %v246_v33  ;;  %v287_v39 = vadd.f32 %v285_v37, %v247_v14  ;;  %v327_v40 = vpop.permute.xlu0 %326  ;;  %v291_v41 = vpop.permute.xlu1 %290  ;;  %v393_v15 = vrot.slane %v1595_v30, %v1511_v16 }
 0x1fb   :  { %v293_v44 = vsel %vm292_vm7, %v289_v17, %v291_v41  ;;  %v294_v45 = vsel %vm292_vm7, %v291_v41, %v289_v17  ;;  %vm596_vm7 = vcmp.lt.s32.totalorder %v1488_v2, 14 }
 0x1fc   :  { %v303_v48 = vmul.f32 %v298_v31, %v294_v45  ;;  %v304_v49 = vmul.f32 %v302_v36, %v293_v44  ;;  %889 = vrot.lane.b32.xlu0 %v1423_v0, %s1302_s25  ;;  %853 = vrot.lane.b32.xlu1 %v1429_v1, %s1300_s23  ;;  %v412_v44 = vrot.slane %v1595_v30, %v1514_v18 }
 0x1fe   :  { %v305_v50 = vadd.f32 %v303_v48, %v265_v10  ;;  %v306_v51 = vadd.f32 %v304_v49, %v266_v47  ;;  %v346_v52 = vpop.permute.xlu0 %345  ;;  %v310_v53 = vpop.permute.xlu1 %309  ;;  %v416_v48 = vrot.slane %v1600_v11, %v1514_v18 }
 0x1ff   :  { %v312_v54 = vsel %vm311_vm8, %v308_v29, %v310_v53  ;;  %v313_v55 = vsel %vm311_vm8, %v310_v53, %v308_v29  ;;  %v378_v29 = vrot.slane %v1508_v13, %v1574_v7  ;;  %vm615_vm8 = vcmp.lt.s32.totalorder %v1488_v2, 13 }
 0x200   :  { %v322_v58 = vmul.f32 %v317_v42, %v313_v55  ;;  %v323_v59 = vmul.f32 %v321_v43, %v312_v54  ;;  %908 = vrot.lane.b32.xlu0 %v1423_v0, %s1303_s26  ;;  %872 = vrot.lane.b32.xlu1 %v1429_v1, %s1301_s24  ;;  %v431_v55 = vrot.slane %v1595_v30, %v1503_v12 }
 0x202   :  { %v324_v61 = vadd.f32 %v322_v58, %v286_v38  ;;  %v325_v62 = vadd.f32 %v323_v59, %v287_v39  ;;  %v365_v63 = vpop.permute.xlu0 %364  ;;  %v329_v3 = vpop.permute.xlu1 %328  ;;  %v397_v38 = vrot.slane %v1600_v11, %v1511_v16  ;;  %v435_v59 = vrot.slane %v1600_v11, %v1503_v12 }
 0x203   :  { %v331_v4 = vsel %vm330_vm9, %v327_v40, %v329_v3  ;;  %v332_v5 = vsel %vm330_vm9, %v329_v3, %v327_v40  ;;  %vm634_vm9 = vcmp.lt.s32.totalorder %v1488_v2, 3 }
 0x204   :  { %v341_v8 = vmul.f32 %v336_v56, %v332_v5  ;;  %v342_v17 = vmul.f32 %v340_v60, %v331_v4  ;;  %927 = vrot.lane.b32.xlu0 %v1423_v0, %s1304_s27  ;;  %891 = vrot.lane.b32.xlu1 %v1429_v1, %s1302_s25  ;;  %v450_v5 = vrot.slane %v1595_v30, %v1517_v20 }
 0x206   :  { %v343_v21 = vadd.f32 %v341_v8, %v305_v50  ;;  %v344_v22 = vadd.f32 %v342_v17, %v306_v51  ;;  %v384_v23 = vpop.permute.xlu0 %383  ;;  %v348_v24 = vpop.permute.xlu1 %347  ;;  %v454_v17 = vrot.slane %v1600_v11, %v1517_v20 }
 0x207   :  { %v350_v9 = vsel %vm349_vm10, %v346_v52, %v348_v24  ;;  %v351_v25 = vsel %vm349_vm10, %v348_v24, %v346_v52  ;;  %vm653_vm10 = vcmp.lt.s32.totalorder %v1488_v2, 2 }
 0x208   :  { %v360_v27 = vmul.f32 %v355_v6, %v351_v25  ;;  %v361_v28 = vmul.f32 %v359_v19, %v350_v9  ;;  %946 = vrot.lane.b32.xlu0 %v1423_v0, %s1305_s28  ;;  %910 = vrot.lane.b32.xlu1 %v1429_v1, %s1303_s26  ;;  %v469_v25 = vrot.slane %v1595_v30, %v1538_v32 }
 0x20a   :  { %v362_v31 = vadd.f32 %v360_v27, %v324_v61  ;;  %v363_v33 = vadd.f32 %v361_v28, %v325_v62  ;;  %v403_v34 = vpop.permute.xlu0 %402  ;;  %v367_v35 = vpop.permute.xlu1 %366  ;;  %v473_v28 = vrot.slane %v1600_v11, %v1538_v32 }
 0x20b   :  { %v369_v36 = vsel %vm368_vm11, %v365_v63, %v367_v35  ;;  %v370_v14 = vsel %vm368_vm11, %v367_v35, %v365_v63  ;;  %vm672_vm11 = vcmp.lt.s32.totalorder %v1488_v2, 1 }
 0x20c   :  { %v379_v13 = vmul.f32 %v374_v26, %v370_v14  ;;  %v380_v37 = vmul.f32 %v378_v29, %v369_v36  ;;  %965 = vrot.lane.b32.xlu0 %v1423_v0, %s1306_s0  ;;  %929 = vrot.lane.b32.xlu1 %v1429_v1, %s1304_s27  ;;  %v488_v14 = vrot.slane %v1595_v30, %v1552_v46 }
 0x20e   :  { %v381_v39 = vadd.f32 %v379_v13, %v343_v21  ;;  %v382_v40 = vadd.f32 %v380_v37, %v344_v22  ;;  %v422_v41 = vpop.permute.xlu0 %421  ;;  %v386_v42 = vpop.permute.xlu1 %385  ;;  %v492_v37 = vrot.slane %v1600_v11, %v1552_v46 }
 0x20f   :  { %v388_v43 = vsel %vm387_vm12, %v384_v23, %v386_v42  ;;  %v389_v10 = vsel %vm387_vm12, %v386_v42, %v384_v23  ;;  %vm703_vm12 = vcmp.lt.s32.totalorder %v1488_v2, 127 }
 0x210   :  { %v398_v45 = vmul.f32 %v393_v15, %v389_v10  ;;  %v399_v47 = vmul.f32 %v397_v38, %v388_v43  ;;  %984 = vrot.lane.b32.xlu0 %v1423_v0, %s1307_s9  ;;  %948 = vrot.lane.b32.xlu1 %v1429_v1, %s1305_s28  ;;  %v507_v10 = vrot.slane %v1595_v30, %v1562_v57 }
 0x212   :  { %v400_v49 = vadd.f32 %v398_v45, %v362_v31  ;;  %v401_v50 = vadd.f32 %v399_v47, %v363_v33  ;;  %v441_v51 = vpop.permute.xlu0 %440  ;;  %v405_v52 = vpop.permute.xlu1 %404  ;;  %v511_v47 = vrot.slane %v1600_v11, %v1562_v57 }
 0x213   :  { %v407_v53 = vsel %vm406_vm13, %v403_v34, %v405_v52  ;;  %v408_v54 = vsel %vm406_vm13, %v405_v52, %v403_v34  ;;  %vm722_vm13 = vcmp.lt.s32.totalorder %v1488_v2, 126 }
 0x214   :  { %v417_v56 = vmul.f32 %v412_v44, %v408_v54  ;;  %v418_v58 = vmul.f32 %v416_v48, %v407_v53  ;;  %1003 = vrot.lane.b32.xlu0 %v1423_v0, %s1308_s10  ;;  %967 = vrot.lane.b32.xlu1 %v1429_v1, %s1306_s0  ;;  %v526_v54 = vrot.slane %v1595_v30, %v1574_v7  ;;  %v1682_v30 = vld [vmem:[%s2249_s5 + $0x28] sm:$0xff] }
 0x216   :  { %v419_v60 = vadd.f32 %v417_v56, %v381_v39  ;;  %v420_v61 = vadd.f32 %v418_v58, %v382_v40  ;;  %v460_v62 = vpop.permute.xlu0 %459  ;;  %v424_v63 = vpop.permute.xlu1 %423  ;;  %v530_v58 = vrot.slane %v1600_v11, %v1574_v7 }
 0x217   :  { %v426_v3 = vsel %vm425_vm14, %v422_v41, %v424_v63  ;;  %v427_v4 = vsel %vm425_vm14, %v424_v63, %v422_v41  ;;  %vm741_vm14 = vcmp.lt.s32.totalorder %v1488_v2, 125 }
 0x218   :  { %v436_v6 = vmul.f32 %v431_v55, %v427_v4  ;;  %v437_v8 = vmul.f32 %v435_v59, %v426_v3  ;;  %1022 = vrot.lane.b32.xlu0 %v1423_v0, %s1309_s11  ;;  %986 = vrot.lane.b32.xlu1 %v1429_v1, %s1307_s9  ;;  %v1677_v59 = vld [vmem:[%s2249_s5 + $0x20] sm:$0xff] }
 0x21a   :  { %v438_v19 = vadd.f32 %v436_v6, %v400_v49  ;;  %v439_v21 = vadd.f32 %v437_v8, %v401_v50  ;;  %v479_v22 = vpop.permute.xlu0 %478  ;;  %v443_v23 = vpop.permute.xlu1 %442  ;;  %v549_v8 = vrot.slane %v1682_v30, %v1511_v16 }
 0x21b   :  { %v445_v24 = vsel %vm444_vm15, %v441_v51, %v443_v23  ;;  %v446_v9 = vsel %vm444_vm15, %v443_v23, %v441_v51  ;;  %vm760_vm15 = vcmp.lt.s32.totalorder %v1488_v2, 115 }
 0x21c   :  { %v455_v26 = vmul.f32 %v450_v5, %v446_v9  ;;  %v456_v27 = vmul.f32 %v454_v17, %v445_v24  ;;  %1041 = vrot.lane.b32.xlu0 %v1423_v0, %s1310_s12  ;;  %1005 = vrot.lane.b32.xlu1 %v1429_v1, %s1308_s10  ;;  %v545_v5 = vrot.slane %v1677_v59, %v1511_v16 }
 0x21d   :  { %v564_v9 = vrot.slane %v1677_v59, %v1514_v18 }
 0x21e   :  { %v457_v29 = vadd.f32 %v455_v26, %v419_v60  ;;  %v458_v31 = vadd.f32 %v456_v27, %v420_v61  ;;  %v498_v33 = vpop.permute.xlu0 %497  ;;  %v462_v34 = vpop.permute.xlu1 %461  ;;  %v568_v27 = vrot.slane %v1682_v30, %v1514_v18 }
 0x21f   :  { %v464_v35 = vsel %vm463_vm0, %v460_v62, %v462_v34  ;;  %v465_v36 = vsel %vm463_vm0, %v462_v34, %v460_v62  ;;  %vm779_vm0 = vcmp.lt.s32.totalorder %v1488_v2, 114 }
 0x220   :  { %v474_v15 = vmul.f32 %v469_v25, %v465_v36  ;;  %v475_v13 = vmul.f32 %v473_v28, %v464_v35  ;;  %1060 = vrot.lane.b32.xlu0 %v1423_v0, %s1311_s13  ;;  %1024 = vrot.lane.b32.xlu1 %v1429_v1, %s1309_s11 }
 0x222   :  { %v476_v38 = vadd.f32 %v474_v15, %v438_v19  ;;  %v477_v39 = vadd.f32 %v475_v13, %v439_v21  ;;  %v517_v40 = vpop.permute.xlu0 %516  ;;  %v481_v41 = vpop.permute.xlu1 %480  ;;  %v583_v15 = vrot.slane %v1677_v59, %v1503_v12  ;;  %v587_v13 = vrot.slane %v1682_v30, %v1503_v12 }
 0x223   :  { %v483_v42 = vsel %vm482_vm1, %v479_v22, %v481_v41  ;;  %v484_v43 = vsel %vm482_vm1, %v481_v41, %v479_v22  ;;  %vm798_vm1 = vcmp.lt.s32.totalorder %v1488_v2, 113 }
 0x224   :  { %v493_v44 = vmul.f32 %v488_v14, %v484_v43  ;;  %v494_v45 = vmul.f32 %v492_v37, %v483_v42  ;;  %1079 = vrot.lane.b32.xlu0 %v1423_v0, %s1312_s14  ;;  %1043 = vrot.lane.b32.xlu1 %v1429_v1, %s1310_s12 }
 0x226   :  { %v495_v48 = vadd.f32 %v493_v44, %v457_v29  ;;  %v496_v49 = vadd.f32 %v494_v45, %v458_v31  ;;  %v536_v50 = vpop.permute.xlu0 %535  ;;  %v500_v51 = vpop.permute.xlu1 %499  ;;  %v602_v44 = vrot.slane %v1677_v59, %v1517_v20  ;;  %v606_v45 = vrot.slane %v1682_v30, %v1517_v20 }
 0x227   :  { %v502_v52 = vsel %vm501_vm2, %v498_v33, %v500_v51  ;;  %v503_v53 = vsel %vm501_vm2, %v500_v51, %v498_v33  ;;  %vm817_vm2 = vcmp.lt.s32.totalorder %v1488_v2, 112 }
 0x228   :  { %v512_v55 = vmul.f32 %v507_v10, %v503_v53  ;;  %v513_v56 = vmul.f32 %v511_v47, %v502_v52  ;;  %1098 = vrot.lane.b32.xlu0 %v1423_v0, %s1313_s15  ;;  %1062 = vrot.lane.b32.xlu1 %v1429_v1, %s1311_s13 }
 0x22a   :  { %v514_v60 = vadd.f32 %v512_v55, %v476_v38  ;;  %v515_v61 = vadd.f32 %v513_v56, %v477_v39  ;;  %v555_v62 = vpop.permute.xlu0 %554  ;;  %v519_v63 = vpop.permute.xlu1 %518  ;;  %v621_v55 = vrot.slane %v1677_v59, %v1538_v32  ;;  %v625_v56 = vrot.slane %v1682_v30, %v1538_v32 }
 0x22b   :  { %v521_v3 = vsel %vm520_vm3, %v517_v40, %v519_v63  ;;  %v522_v4 = vsel %vm520_vm3, %v519_v63, %v517_v40  ;;  %vm836_vm3 = vcmp.lt.s32.totalorder %v1488_v2, 111 }
 0x22c   :  { %v531_v11 = vmul.f32 %v526_v54, %v522_v4  ;;  %v532_v6 = vmul.f32 %v530_v58, %v521_v3  ;;  %1117 = vrot.lane.b32.xlu0 %v1423_v0, %s1314_s17  ;;  %1081 = vrot.lane.b32.xlu1 %v1429_v1, %s1312_s14 }
 0x22e   :  { %v533_v17 = vadd.f32 %v531_v11, %v495_v48  ;;  %v534_v19 = vadd.f32 %v532_v6, %v496_v49  ;;  %v574_v21 = vpop.permute.xlu0 %573  ;;  %v538_v22 = vpop.permute.xlu1 %537  ;;  %v640_v11 = vrot.slane %v1677_v59, %v1552_v46  ;;  %v644_v6 = vrot.slane %v1682_v30, %v1552_v46 }
 0x22f   :  { %v540_v23 = vsel %vm539_vm4, %v536_v50, %v538_v22  ;;  %v541_v24 = vsel %vm539_vm4, %v538_v22, %v536_v50  ;;  %vm855_vm4 = vcmp.lt.s32.totalorder %v1488_v2, 110 }
 0x230   :  { %v550_v25 = vmul.f32 %v545_v5, %v541_v24  ;;  %v551_v26 = vmul.f32 %v549_v8, %v540_v23  ;;  %1136 = vrot.lane.b32.xlu0 %v1423_v0, %s1315_s18  ;;  %1100 = vrot.lane.b32.xlu1 %v1429_v1, %s1313_s15 }
 0x232   :  { %v552_v28 = vadd.f32 %v550_v25, %v514_v60  ;;  %v553_v29 = vadd.f32 %v551_v26, %v515_v61  ;;  %v593_v31 = vpop.permute.xlu0 %592  ;;  %v557_v33 = vpop.permute.xlu1 %556  ;;  %v659_v25 = vrot.slane %v1677_v59, %v1562_v57  ;;  %v663_v26 = vrot.slane %v1682_v30, %v1562_v57 }
 0x233   :  { %v559_v34 = vsel %vm558_vm5, %v555_v62, %v557_v33  ;;  %v560_v35 = vsel %vm558_vm5, %v557_v33, %v555_v62  ;;  %vm874_vm5 = vcmp.lt.s32.totalorder %v1488_v2, 109 }
 0x234   :  { %v569_v36 = vmul.f32 %v564_v9, %v560_v35  ;;  %v570_v14 = vmul.f32 %v568_v27, %v559_v34  ;;  %1119 = vrot.lane.b32.xlu1 %v1429_v1, %s1314_s17 }
 0x236   :  { %v571_v37 = vadd.f32 %v569_v36, %v533_v17  ;;  %v572_v38 = vadd.f32 %v570_v14, %v534_v19  ;;  %v612_v39 = vpop.permute.xlu0 %611  ;;  %v576_v40 = vpop.permute.xlu1 %575  ;;  %v678_v14 = vrot.slane %v1677_v59, %v1574_v7 }
 0x237   :  { %v578_v41 = vsel %vm577_vm6, %v574_v21, %v576_v40  ;;  %v579_v42 = vsel %vm577_vm6, %v576_v40, %v574_v21  ;;  %v1735_v40 = vld [vmem:[%s2249_s5 + $0x30] sm:$0xff]  ;;  %vm893_vm6 = vcmp.lt.s32.totalorder %v1488_v2, 99 }
 0x238   :  { %v588_v43 = vmul.f32 %v583_v15, %v579_v42  ;;  %v589_v10 = vmul.f32 %v587_v13, %v578_v41  ;;  %1138 = vrot.lane.b32.xlu1 %v1429_v1, %s1315_s18  ;;  %v682_v15 = vrot.slane %v1682_v30, %v1574_v7 }
 0x23a   :  { %v590_v47 = vadd.f32 %v588_v43, %v552_v28  ;;  %v591_v48 = vadd.f32 %v589_v10, %v553_v29  ;;  %v631_v49 = vpop.permute.xlu0 %630  ;;  %v595_v50 = vpop.permute.xlu1 %594  ;;  %v1740_v43 = vld [vmem:[%s2249_s5 + $0x38] sm:$0xff]  ;;  %v709_v10 = vrot.slane %v1735_v40, %v1514_v18 }
 0x23b   :  { %v597_v51 = vsel %vm596_vm7, %v593_v31, %v595_v50  ;;  %v598_v52 = vsel %vm596_vm7, %v595_v50, %v593_v31  ;;  %vm912_vm7 = vcmp.lt.s32.totalorder %v1488_v2, 98 }
 0x23c   :  { %v607_v53 = vmul.f32 %v602_v44, %v598_v52  ;;  %v608_v54 = vmul.f32 %v606_v45, %v597_v51  ;;  %v713_v44 = vrot.slane %v1740_v43, %v1514_v18  ;;  %v690_v45 = vrot.slane %v1735_v40, %v1511_v16 }
 0x23d   :  { %v694_v51 = vrot.slane %v1740_v43, %v1511_v16 }
 0x23e   :  { %v609_v58 = vadd.f32 %v607_v53, %v571_v37  ;;  %v610_v60 = vadd.f32 %v608_v54, %v572_v38  ;;  %v650_v61 = vpop.permute.xlu0 %649  ;;  %v614_v62 = vpop.permute.xlu1 %613 }
 0x23f   :  { %v616_v63 = vsel %vm615_vm8, %v612_v39, %v614_v62  ;;  %v617_v3 = vsel %vm615_vm8, %v614_v62, %v612_v39  ;;  %vm931_vm8 = vcmp.lt.s32.totalorder %v1488_v2, 97 }
 0x240   :  { %v626_v4 = vmul.f32 %v621_v55, %v617_v3  ;;  %v627_v5 = vmul.f32 %v625_v56, %v616_v63  ;;  %v728_v56 = vrot.slane %v1735_v40, %v1503_v12 }
 0x242   :  { %v628_v8 = vadd.f32 %v626_v4, %v590_v47  ;;  %v629_v17 = vadd.f32 %v627_v5, %v591_v48  ;;  %v669_v19 = vpop.permute.xlu0 %668  ;;  %v633_v21 = vpop.permute.xlu1 %632  ;;  %v696_v4 = vmul.f32 %v694_v51, %v1429_v1  ;;  %v1823_v51 = vld [vmem:[%s2249_s5 + $0x40] sm:$0xff] }
 0x243   :  { %v635_v22 = vsel %vm634_vm9, %v631_v49, %v633_v21  ;;  %v636_v23 = vsel %vm634_vm9, %v633_v21, %v631_v49  ;;  %vm950_vm9 = vcmp.lt.s32.totalorder %v1488_v2, 96 }
 0x244   :  { %v645_v24 = vmul.f32 %v640_v11, %v636_v23  ;;  %v646_v9 = vmul.f32 %v644_v6, %v635_v22  ;;  %v747_v6 = vrot.slane %v1735_v40, %v1517_v20 }
 0x246   :  { %v647_v27 = vadd.f32 %v645_v24, %v609_v58  ;;  %v648_v28 = vadd.f32 %v646_v9, %v610_v60  ;;  %v700_v29 = vpop.permute.xlu0 %699  ;;  %v652_v31 = vpop.permute.xlu1 %651  ;;  %v732_v58 = vrot.slane %v1740_v43, %v1503_v12  ;;  %v695_v60 = vmul.f32 %v1423_v0, %v690_v45 }
 0x247   :  { %v654_v33 = vsel %vm653_vm10, %v650_v61, %v652_v31  ;;  %v655_v34 = vsel %vm653_vm10, %v652_v31, %v650_v61  ;;  %vm969_vm10 = vcmp.lt.s32.totalorder %v1488_v2, 95 }
 0x248   :  { %v664_v35 = vmul.f32 %v659_v25, %v655_v34  ;;  %v665_v36 = vmul.f32 %v663_v26, %v654_v33 }
 0x24a   :  { %v666_v13 = vadd.f32 %v664_v35, %v628_v8  ;;  %v667_v37 = vadd.f32 %v665_v36, %v629_v17  ;;  %v719_v38 = vpop.permute.xlu0 %718  ;;  %v671_v39 = vpop.permute.xlu1 %670  ;;  %v751_v8 = vrot.slane %v1740_v43, %v1517_v20 }
 0x24b   :  { %v673_v41 = vsel %vm672_vm11, %v669_v19, %v671_v39  ;;  %v674_v42 = vsel %vm672_vm11, %v671_v39, %v669_v19  ;;  %vm988_vm11 = vcmp.lt.s32.totalorder %v1488_v2, 94 }
 0x24c   :  { %v683_v59 = vmul.f32 %v678_v14, %v674_v42  ;;  %v684_v30 = vmul.f32 %v682_v15, %v673_v41  ;;  %v697_v17 = vadd.f32 %v695_v60, %v666_v13  ;;  %v698_v19 = vadd.f32 %v696_v4, %v667_v37 }
 0x24d   :  { %v808_v60 = vrot.slane %v1740_v43, %v1562_v57 }
 0x24e   :  { %v685_v47 = vadd.f32 %v683_v59, %v647_v27  ;;  %v686_v48 = vadd.f32 %v684_v30, %v648_v28  ;;  %v738_v49 = vpop.permute.xlu0 %737  ;;  %v702_v50 = vpop.permute.xlu1 %701 }
 0x24f   :  { %v704_v52 = vsel %vm703_vm12, %v700_v29, %v702_v50  ;;  %v705_v53 = vsel %vm703_vm12, %v702_v50, %v700_v29  ;;  %v770_v50 = vrot.slane %v1740_v43, %v1538_v32  ;;  %vm1007_vm12 = vcmp.lt.s32.totalorder %v1488_v2, 93 }
 0x250   :  { %v714_v54 = vmul.f32 %v709_v10, %v704_v52  ;;  %v715_v55 = vmul.f32 %v713_v44, %v705_v53  ;;  %v1828_v52 = vld [vmem:[%s2249_s5 + $0x48] sm:$0xff] }
 0x252   :  { %v716_v61 = vadd.f32 %v714_v54, %v685_v47  ;;  %v717_v62 = vadd.f32 %v715_v55, %v686_v48  ;;  %v1757_v63 = vpop.permute.xlu0 %756  ;;  %v721_v3 = vpop.permute.xlu1 %720  ;;  %v785_v55 = vrot.slane %v1735_v40, %v1552_v46 }
 0x253   :  { %v723_v5 = vsel %vm722_vm13, %v719_v38, %v721_v3  ;;  %v724_v11 = vsel %vm722_vm13, %v721_v3, %v719_v38  ;;  %v842_v3 = vrot.slane %v1823_v51, %v1511_v16  ;;  %vm1026_vm13 = vcmp.lt.s32.totalorder %v1488_v2, 83 }
 0x254   :  { %v733_v0 = vmul.f32 %v728_v56, %v723_v5  ;;  %v734_v21 = vmul.f32 %v732_v58, %v724_v11  ;;  %v789_v56 = vrot.slane %v1740_v43, %v1552_v46  ;;  %v804_v58 = vrot.slane %v1735_v40, %v1562_v57 }
 0x256   :  { %v1765_v22 = vadd.f32 %v733_v0, %v697_v17  ;;  %v1767_v23 = vadd.f32 %v734_v21, %v698_v19  ;;  %v1769_v24 = vpop.permute.xlu0 %775  ;;  %v740_v1 = vpop.permute.xlu1 %739  ;;  %v1870_v0 = vld [vmem:[%s2249_s5 + $0x50] sm:$0xff]  ;;  %v1875_v21 = vld [vmem:[%s2249_s5 + $0x58] sm:$0xff] }
 0x257   :  { %v742_v9 = vsel %vm741_vm14, %v738_v49, %v740_v1  ;;  %v743_v25 = vsel %vm741_vm14, %v740_v1, %v738_v49  ;;  %v766_v49 = vrot.slane %v1735_v40, %v1538_v32  ;;  %vm1045_vm14 = vcmp.lt.s32.totalorder %v1488_v2, 82 }
 0x258   :  { %v752_v26 = vmul.f32 %v747_v6, %v742_v9  ;;  %v753_v27 = vmul.f32 %v751_v8, %v743_v25 }
 0x25a   :  { %v1771_v28 = vadd.f32 %v752_v26, %v716_v61  ;;  %v1773_v29 = vadd.f32 %v753_v27, %v717_v62  ;;  %v1775_v31 = vpop.permute.xlu0 %794  ;;  %v1777_v33 = vpop.permute.xlu1 %758  ;;  %v823_v61 = vrot.slane %v1735_v40, %v1574_v7  ;;  %v827_v62 = vrot.slane %v1740_v43, %v1574_v7 }
 0x25b   :  { %v761_v1 = vsel %vm760_vm15, %v1757_v63, %v1777_v33  ;;  %v762_v9 = vsel %vm760_vm15, %v1777_v33, %v1757_v63  ;;  %vm1064_vm15 = vcmp.lt.s32.totalorder %v1488_v2, 81 }
 0x25c   :  { %v772_v4 = vmul.f32 %v770_v50, %v762_v9 }
 0x25e   :  { %v1779_v34 = vpop.permute.xlu0 %813  ;;  %v1781_v35 = vpop.permute.xlu1 %777  ;;  %v774_v40 = vadd.f32 %v772_v4, %v1767_v23 }
 0x25f   :  { %v780_v26 = vsel %vm779_vm0, %v1769_v24, %v1781_v35  ;;  %v781_v63 = vsel %vm779_vm0, %v1781_v35, %v1769_v24  ;;  %v1074_v24 = vrot.slane %v1875_v21, %v1538_v32  ;;  %v771_v35 = vmul.f32 %v766_v49, %v761_v1 }
 0x260   :  { %v790_v33 = vmul.f32 %v785_v55, %v780_v26  ;;  %v791_v11 = vmul.f32 %v789_v56, %v781_v63  ;;  %v1108_v55 = vrot.slane %v1870_v0, %v1562_v57  ;;  %vm1083_vm0 = vcmp.lt.s32.totalorder %v1488_v2, 80 }
 0x262   :  { %v1783_v36 = vpop.permute.xlu0 %832  ;;  %v1785_v14 = vpop.permute.xlu1 %796  ;;  %v793_v43 = vadd.f32 %v791_v11, %v1773_v29 }
 0x263   :  { %v799_v27 = vsel %vm798_vm1, %v1775_v31, %v1785_v14  ;;  %v800_v8 = vsel %vm798_vm1, %v1785_v14, %v1775_v31  ;;  %v1089_v31 = vrot.slane %v1870_v0, %v1552_v46  ;;  %v1093_v14 = vrot.slane %v1875_v21, %v1552_v46 }
 0x264   :  { %v810_v56 = vmul.f32 %v808_v60, %v800_v8  ;;  %vm1102_vm1 = vcmp.lt.s32.totalorder %v1488_v2, 79 }
 0x266   :  { %v1787_v15 = vpop.permute.xlu0 %851  ;;  %v1789_v13 = vpop.permute.xlu1 %815 }
 0x267   :  { %v818_v5 = vsel %vm817_vm2, %v1779_v34, %v1789_v13  ;;  %v819_v49 = vsel %vm817_vm2, %v1789_v13, %v1779_v34  ;;  %v1112_v34 = vrot.slane %v1875_v21, %v1562_v57  ;;  %v809_v13 = vmul.f32 %v804_v58, %v799_v27 }
 0x268   :  { %v828_v63 = vmul.f32 %v823_v61, %v818_v5  ;;  %v829_v58 = vmul.f32 %v827_v62, %v819_v49  ;;  %v2254_v49 = vrot.slane %v1823_v51, %v1503_v12  ;;  %vm1121_vm2 = vcmp.lt.s32.totalorder %v1488_v2, 78 }
 0x26a   :  { %v1791_v37 = vpop.permute.xlu0 %870  ;;  %v1793_v38 = vpop.permute.xlu1 %834 }
 0x26b   :  { %v837_v9 = vsel %vm836_vm3, %v1783_v36, %v1793_v38  ;;  %v838_v26 = vsel %vm836_vm3, %v1793_v38, %v1783_v36  ;;  %v773_v36 = vadd.f32 %v771_v35, %v1765_v22  ;;  %v792_v38 = vadd.f32 %v790_v33, %v1771_v28 }
 0x26c   :  { %v847_v5 = vmul.f32 %v842_v3, %v837_v9  ;;  %v2252_v28 = vrot.slane %v1823_v51, %v1514_v18  ;;  %v2253_v3 = vrot.slane %v1828_v52, %v1514_v18  ;;  %v831_v35 = vadd.f32 %v829_v58, %v793_v43 }
 0x26d   :  { %v830_v33 = vadd.f32 %v828_v63, %v792_v38  ;;  %v2257_v63 = vrot.slane %v1828_v52, %v1517_v20  ;;  %vm1140_vm3 = vcmp.lt.s32.totalorder %v1488_v2, 77 }
 0x26e   :  { %v1795_v39 = vpop.permute.xlu0 %889  ;;  %v1797_v41 = vpop.permute.xlu1 %853 }
 0x26f   :  { %v856_v60 = vsel %vm855_vm4, %v1787_v15, %v1797_v41  ;;  %v857_v8 = vsel %vm855_vm4, %v1797_v41, %v1787_v15  ;;  %v2251_v15 = vrot.slane %v1828_v52, %v1511_v16 }
 0x270   :  { %v866_v29 = vmul.f32 %v2252_v28, %v856_v60  ;;  %v867_v4 = vmul.f32 %v2253_v3, %v857_v8  ;;  %v2259_v28 = vrot.slane %v1828_v52, %v1538_v32 }
 0x271   :  { %v848_v41 = vmul.f32 %v2251_v15, %v838_v26  ;;  %v2255_v26 = vrot.slane %v1828_v52, %v1503_v12 }
 0x272   :  { %v1799_v42 = vpop.permute.xlu0 %908  ;;  %v1801_v59 = vpop.permute.xlu1 %872  ;;  %v868_v38 = vadd.f32 %v866_v29, %v830_v33  ;;  %v869_v43 = vadd.f32 %v867_v4, %v831_v35  ;;  %v2261_v29 = vrot.slane %v1828_v52, %v1552_v46  ;;  %v2262_v35 = vrot.slane %v1823_v51, %v1562_v57 }
 0x273   :  { %v875_v22 = vsel %vm874_vm5, %v1791_v37, %v1801_v59  ;;  %v876_v23 = vsel %vm874_vm5, %v1801_v59, %v1791_v37  ;;  %v811_v37 = vadd.f32 %v809_v13, %v773_v36  ;;  %v812_v59 = vadd.f32 %v810_v56, %v774_v40 }
 0x274   :  { %v885_v9 = vmul.f32 %v2254_v49, %v875_v22  ;;  %v886_v60 = vmul.f32 %v2255_v26, %v876_v23  ;;  %v2256_v13 = vrot.slane %v1823_v51, %v1517_v20  ;;  %v2258_v22 = vrot.slane %v1823_v51, %v1538_v32 }
 0x275   :  { %v850_v40 = vadd.f32 %v848_v41, %v812_v59  ;;  %v2263_v26 = vrot.slane %v1828_v52, %v1562_v57 }
 0x276   :  { %v1803_v30 = vpop.permute.xlu0 %927  ;;  %v1805_v10 = vpop.permute.xlu1 %891 }
 0x277   :  { %v894_v11 = vsel %vm893_vm6, %v1795_v39, %v1805_v10  ;;  %v895_v27 = vsel %vm893_vm6, %v1805_v10, %v1795_v39 }
 0x278   :  { %v904_v56 = vmul.f32 %v2256_v13, %v894_v11  ;;  %v905_v58 = vmul.f32 %v2257_v63, %v895_v27 }
 0x27a   :  { %v1807_v44 = vpop.permute.xlu0 %946  ;;  %v1809_v45 = vpop.permute.xlu1 %910  ;;  %v906_v59 = vadd.f32 %v904_v56, %v868_v38  ;;  %v907_v33 = vadd.f32 %v905_v58, %v869_v43  ;;  %v1127_v56 = vrot.slane %v1870_v0, %v1574_v7 }
 0x27b   :  { %v913_v8 = vsel %vm912_vm7, %v1799_v42, %v1809_v45  ;;  %v914_v39 = vsel %vm912_vm7, %v1809_v45, %v1799_v42  ;;  %v849_v45 = vadd.f32 %v847_v5, %v811_v37  ;;  %v2260_v5 = vrot.slane %v1823_v51, %v1552_v46  ;;  %v1200_v46 = vld [vmem:[%s2249_s5 + $0x60] ss:$0 sm:$0xff] }
 0x27c   :  { %v923_v23 = vmul.f32 %v2258_v22, %v913_v8  ;;  %v924_v3 = vmul.f32 %v2259_v28, %v914_v39  ;;  %v888_v37 = vadd.f32 %v886_v60, %v850_v40  ;;  %v2265_v39 = vrot.slane %v1828_v52, %v1574_v7 }
 0x27d   :  { %v887_v27 = vadd.f32 %v885_v9, %v849_v45  ;;  %v2264_v9 = vrot.slane %v1823_v51, %v1574_v7  ;;  %v1131_v28 = vrot.slane %v1875_v21, %v1574_v7  ;;  %v2269_v7 = vrot.slane %v1875_v21, %v1514_v18 }
 0x27e   :  { %v1811_v47 = vpop.permute.xlu0 %965  ;;  %v1813_v48 = vpop.permute.xlu1 %929  ;;  %v926_v58 = vadd.f32 %v924_v3, %v888_v37  ;;  %v2270_v37 = vrot.slane %v1870_v0, %v1503_v12 }
 0x27f   :  { %v932_v36 = vsel %vm931_vm8, %v1803_v30, %v1813_v48  ;;  %v933_v42 = vsel %vm931_vm8, %v1813_v48, %v1803_v30  ;;  %v925_v63 = vadd.f32 %v923_v23, %v887_v27 }
 0x280   :  { %v942_v41 = vmul.f32 %v2260_v5, %v932_v36  ;;  %v943_v4 = vmul.f32 %v2261_v29, %v933_v42 }
 0x282   :  { %v1830_v53 = vpop.permute.xlu0 %984  ;;  %v1832_v54 = vpop.permute.xlu1 %948  ;;  %v944_v36 = vadd.f32 %v942_v41, %v906_v59  ;;  %v945_v42 = vadd.f32 %v943_v4, %v907_v33  ;;  %v2271_v33 = vrot.slane %v1875_v21, %v1503_v12 }
 0x283   :  { %v951_v30 = vsel %vm950_vm9, %v1807_v44, %v1832_v54  ;;  %v952_v48 = vsel %vm950_vm9, %v1832_v54, %v1807_v44 }
 0x284   :  { %v961_v49 = vmul.f32 %v2262_v35, %v951_v30  ;;  %v962_v8 = vmul.f32 %v2263_v26, %v952_v48  ;;  %v2272_v26 = vrot.slane %v1870_v0, %v1517_v20 }
 0x286   :  { %v1863_v17 = vpop.permute.xlu0 %1003  ;;  %v1865_v19 = vpop.permute.xlu1 %967  ;;  %v963_v22 = vadd.f32 %v961_v49, %v925_v63  ;;  %v964_v23 = vadd.f32 %v962_v8, %v926_v58 }
 0x287   :  { %v970_v11 = vsel %vm969_vm10, %v1811_v47, %v1865_v19  ;;  %v971_v44 = vsel %vm969_vm10, %v1865_v19, %v1811_v47 }
 0x288   :  { %v980_v60 = vmul.f32 %v2264_v9, %v970_v11  ;;  %v981_v13 = vmul.f32 %v2265_v39, %v971_v44 }
 0x28a   :  { %v1911_v25 = vpop.permute.xlu0 %1022  ;;  %v1913_v6 = vpop.permute.xlu1 %986  ;;  %v982_v3 = vadd.f32 %v980_v60, %v944_v36  ;;  %v983_v30 = vadd.f32 %v981_v13, %v945_v42  ;;  %v2274_v60 = vrot.slane %v1870_v0, %v1538_v32 }
 0x28b   :  { %v989_v47 = vsel %vm988_vm11, %v1830_v53, %v1913_v6  ;;  %v990_v19 = vsel %vm988_vm11, %v1913_v6, %v1830_v53  ;;  %v2266_v53 = vrot.slane %v1870_v0, %v1511_v16  ;;  %v2267_v6 = vrot.slane %v1875_v21, %v1511_v16 }
 0x28d   :  { %v999_v51 = vmul.f32 %v2266_v53, %v989_v47  ;;  %v1000_v52 = vmul.f32 %v2267_v6, %v990_v19 }
 0x28e   :  { %v1958_v50 = vpop.permute.xlu0 %1041  ;;  %v1960_v1 = vpop.permute.xlu1 %1005 }
 0x28f   :  { %v1008_v38 = vsel %vm1007_vm12, %v1863_v17, %v1960_v1  ;;  %v1009_v43 = vsel %vm1007_vm12, %v1960_v1, %v1863_v17  ;;  %v2268_v17 = vrot.slane %v1870_v0, %v1514_v18  ;;  %v1001_v44 = vadd.f32 %v999_v51, %v963_v22 }
 0x290   :  { %v1019_v41 = vmul.f32 %v2269_v7, %v1009_v43  ;;  %v1002_v27 = vadd.f32 %v1000_v52, %v964_v23 }
 0x291   :  { %v1018_v1 = vmul.f32 %v2268_v17, %v1008_v38 }
 0x292   :  { %v2004_v61 = vpop.permute.xlu0 %1060  ;;  %v2006_v62 = vpop.permute.xlu1 %1024  ;;  %v1021_v9 = vadd.f32 %v1019_v41, %v983_v30 }
 0x293   :  { %v1027_v48 = vsel %vm1026_vm13, %v1911_v25, %v2006_v62  ;;  %v1028_v5 = vsel %vm1026_vm13, %v2006_v62, %v1911_v25  ;;  %v1020_v19 = vadd.f32 %v1018_v1, %v982_v3 }
 0x294   :  { %v1037_v59 = vmul.f32 %v2270_v37, %v1027_v48  ;;  %v1038_v35 = vmul.f32 %v2271_v33, %v1028_v5  ;;  %v1182_v33 = vld [vmem:[%s2245_s1 + $0x8] sm:$0xf0] }
 0x296   :  { %v1044_v10 = vpop.permute.xlu1 %1043  ;;  %v1080_v15 = vpop.permute.xlu0 %1079  ;;  %v1039_v42 = vadd.f32 %v1037_v59, %v1001_v44  ;;  %v1168_v59 = vld [vmem:[%s2245_s1 + $0x8] sm:$0xf] }
 0x297   :  { %v1046_v29 = vsel %vm1045_vm14, %v1958_v50, %v1044_v10  ;;  %v1047_v4 = vsel %vm1045_vm14, %v1044_v10, %v1958_v50 }
 0x298   :  { %v1056_v8 = vmul.f32 %v2272_v26, %v1046_v29 }
 0x29a   :  { %v1063_v54 = vpop.permute.xlu1 %1062  ;;  %v1099_v45 = vpop.permute.xlu0 %1098 }
 0x29b   :  { %v1065_v25 = vsel %vm1064_vm15, %v2004_v61, %v1063_v54  ;;  %v1066_v62 = vsel %vm1064_vm15, %v1063_v54, %v2004_v61  ;;  %v2273_v61 = vrot.slane %v1875_v21, %v1517_v20 }
 0x29c   :  { %v1076_v39 = vmul.f32 %v1074_v24, %v1066_v62  ;;  %v1181_v62 = vld [vmem:[%s2245_s1] sm:$0xf0] }
 0x29d   :  { %v1057_v54 = vmul.f32 %v2273_v61, %v1047_v4 }
 0x29e   :  { %v1082_v40 = vpop.permute.xlu1 %1081  ;;  %v1118_v50 = vpop.permute.xlu0 %1117 }
 0x29f   :  { %v1084_v10 = vsel %vm1083_vm0, %v1080_v15, %v1082_v40  ;;  %v1085_v49 = vsel %vm1083_vm0, %v1082_v40, %v1080_v15  ;;  %v1075_v15 = vmul.f32 %v2274_v60, %v1065_v25  ;;  %v1059_v40 = vadd.f32 %v1057_v54, %v1021_v9  ;;  %v1167_v25 = vld [vmem:[%s2245_s1] sm:$0xf] }
 0x2a0   :  { %v1094_v20 = vmul.f32 %v1089_v31, %v1084_v10  ;;  %v1095_v63 = vmul.f32 %v1093_v14, %v1085_v49  ;;  %v1058_v31 = vadd.f32 %v1056_v8, %v1020_v19  ;;  %v1201_v14 = vld [vmem:[%s2249_s5 + $0x68] ss:$0 sm:$0xff] }
 0x2a1   :  { %v1077_v53 = vadd.f32 %v1075_v15, %v1039_v42 }
 0x2a2   :  { %v1101_v11 = vpop.permute.xlu1 %1100  ;;  %v1137_v6 = vpop.permute.xlu0 %1136  ;;  %v1096_v38 = vadd.f32 %v1094_v20, %v1058_v31  ;;  %v1097_v43 = vadd.f32 %v1095_v63, %v1059_v40 }
 0x2a3   :  { %v1103_v47 = vsel %vm1102_vm1, %v1099_v45, %v1101_v11  ;;  %v1104_v12 = vsel %vm1102_vm1, %v1101_v11, %v1099_v45  ;;  %v1040_v45 = vadd.f32 %v1038_v35, %v1002_v27 }
 0x2a4   :  { %v1113_v32 = vmul.f32 %v1108_v55, %v1103_v47  ;;  %v1114_v24 = vmul.f32 %v1112_v34, %v1104_v12 }
 0x2a5   :  { %v1078_v51 = vadd.f32 %v1076_v39, %v1040_v45 }
 0x2a6   :  { %v1120_v13 = vpop.permute.xlu1 %1119  ;;  %v1115_v34 = vadd.f32 %v1113_v32, %v1077_v53 }
 0x2a7   :  { %v1122_v58 = vsel %vm1121_vm2, %v1118_v50, %v1120_v13  ;;  %v1123_v36 = vsel %vm1121_vm2, %v1120_v13, %v1118_v50  ;;  %v1116_v22 = vadd.f32 %v1114_v24, %v1078_v51 }
 0x2a8   :  { %v1132_v52 = vmul.f32 %v1127_v56, %v1122_v58  ;;  %v1133_v0 = vmul.f32 %v1131_v28, %v1123_v36 }
 0x2aa   :  { %v1139_v55 = vpop.permute.xlu1 %1138  ;;  %v1134_v30 = vadd.f32 %v1132_v52, %v1096_v38  ;;  %v1135_v48 = vadd.f32 %v1133_v0, %v1097_v43 }
 0x2ab   :  { %v1141_v57 = vsel %vm1140_vm3, %v1137_v6, %v1139_v55  ;;  %v1142_v21 = vsel %vm1140_vm3, %v1139_v55, %v1137_v6 }
 0x2ac   :  { %v1151_v23 = vmul.f32 %v1200_v46, %v1141_v57  ;;  %v1152_v3 = vmul.f32 %v1201_v14, %v1142_v21 }
 0x2ae   :  { %v1153_v5 = vadd.f32 %v1151_v23, %v1115_v34  ;;  %v1154_v17 = vadd.f32 %v1152_v3, %v1116_v22 }
 0x2b0   :  { %v1155_v1 = vadd.f32 %v1153_v5, %v1134_v30  ;;  %v1156_v56 = vadd.f32 %v1154_v17, %v1135_v48 }
 0x2b2   :  { %v1157_v28 = vsub.f32 0.0, %v1155_v1  ;;  %v1158_v7 = vsub.f32 0.0, %v1156_v56 }
 0x2b4   :  { %v1159_v41 = vmul.f32 1.442695, %v1157_v28  ;;  %v1161_v29 = vmul.f32 1.442695, %v1158_v7 }
 0x2b6   :  { %1259 = vpow2.f32 %v1159_v41 }
 0x2b7   :  { %1261 = vpow2.f32 %v1161_v29 }
 0x2c0   :  { %v1260_v4 = vpop.eup %1259 }
 0x2c1   :  { %v1262_v11 = vpop.eup %1261  ;;  %v1163_v2 = vadd.f32 1.0, %v1260_v4 }
 0x2c2   :  { %v1164_v44 = vadd.f32 1.0, %v1262_v11 }
 0x2c3   :  { %1263 = vrcp.f32 %v1163_v2 }
 0x2c4   :  { %1265 = vrcp.f32 %v1164_v44 }
 0x2cd   :  { %v1264_v27 = vpop.eup %1263 }
 0x2ce   :  { %v1266_v37 = vpop.eup %1265  ;;  %v1172_v35 = vrot.slane %v1264_v27, %v1511_v16  ;;  %v1186_v50 = vrot.slane %v1264_v27, %v1514_v18 }
 0x2cf   :  { %v1176_v10 = vrot.slane %v1266_v37, %v1511_v16  ;;  %v1190_v49 = vrot.slane %v1266_v37, %v1514_v18 }
 0x2d0   :  { %v1177_v26 = vmul.f32 %v1172_v35, %v1167_v25  ;;  %v1191_v8 = vmul.f32 %v1186_v50, %v1181_v62 }
 0x2d1   :  { %v1178_v61 = vmul.f32 %v1176_v10, %v1168_v59  ;;  %v1192_v54 = vmul.f32 %v1190_v49, %v1182_v33 }
 0x2d2   :  { %1179 = vst [vmem:[%s2250_s6] sm:$0xf] %v1177_v26  ;;  %1193 = vst [vmem:[%s2250_s6] sm:$0xf0] %v1191_v8 }
 0x2d3   :  { %1180 = vst [vmem:[%s2250_s6 + $0x8] sm:$0xf] %v1178_v61  ;;  %1194 = vst [vmem:[%s2250_s6 + $0x8] sm:$0xf0] %v1192_v54 }

</bundles_post_ra>
